<compile_context>
chip_gen: v6e
topology: v6e:2x2x1
jax: 0.10.0
libtpu: 0.0.40
codegen_flags: <defaults>
</compile_context>

<pallas_src>
import math

import jax
import jax.numpy as jnp
from jax import lax
from jax.experimental import pallas as pl
from jax.experimental.pallas import tpu as pltpu

_NEG_BIG = -1e30


def _make_kernel(n_valid, tile_n, lp, m):
    """n_valid, tile_n, lp (L padded to a lane multiple), m are static ints."""

    def kernel(x_ref, wvu_ref, bvu_ref, ww_ref, wc_ref, sc_ref,
               yprob_ref, yhat_ref, alog_ref, m_ref, l_ref, z_ref):
        i = pl.program_id(0)

        @pl.when(i == 0)
        def _init():
            m_ref[...] = jnp.full((1, 1), _NEG_BIG, jnp.float32)
            l_ref[...] = jnp.zeros((1, 1), jnp.float32)
            z_ref[...] = jnp.zeros((1, m), jnp.float32)

        x_t = x_ref[...]                                    # (tile_n, M) bf16
        bw = sc_ref[0]                                      # scalar f32 (SMEM)

        # Fused attention_V / attention_U projection: one bf16 MXU matmul.
        h = jnp.dot(x_t, wvu_ref[...],
                    preferred_element_type=jnp.float32) + bvu_ref[...]
        gate = jnp.tanh(h[:, :lp]) * jax.nn.sigmoid(h[:, lp:])   # (tile_n, Lp) f32

        # attention_w: lane-dense (1, tile_n) logits = ww_row @ gate^T on the MXU.
        logits = lax.dot_general(
            ww_ref[...], gate, (((1,), (1,)), ((), ())),
            preferred_element_type=jnp.float32) + bw        # (1, tile_n)

        # Mask padded instances in the (possibly ragged) last tile.
        col = i * tile_n + lax.broadcasted_iota(jnp.int32, (1, tile_n), 1)
        logits = jnp.where(col < n_valid, logits, _NEG_BIG)

        # Stream the raw logits out (blocked output -> pipelined writeback).
        alog_ref[...] = logits

        # Online softmax + weighted-sum-of-x accumulation (single pass over x).
        m_prev = m_ref[...]
        m_new = jnp.maximum(m_prev, jnp.max(logits, axis=1, keepdims=True))
        alpha = jnp.exp(m_prev - m_new)
        p = jnp.exp(logits - m_new)                         # (1, tile_n) f32
        l_ref[...] = alpha * l_ref[...] + jnp.sum(p, axis=1, keepdims=True)
        z_ref[...] = alpha * z_ref[...] + jnp.dot(
            p.astype(x_t.dtype), x_t, preferred_element_type=jnp.float32)
        m_ref[...] = m_new

        # Classifier head on the last tile (exact f32 division, runs once).
        @pl.when(i == pl.num_programs(0) - 1)
        def _finalize():
            z = z_ref[...] / l_ref[...]                     # (1, M)
            y_logit = jnp.sum(z * wc_ref[...], axis=1, keepdims=True) + sc_ref[1]
            y_prob = jax.nn.sigmoid(y_logit)
            yprob_ref[...] = y_prob
            yhat_ref[...] = (y_prob >= 0.5).astype(jnp.float32)

    return kernel


def pack_params(params, lp):
    """Fuse V/U weights into one bf16 (M, 2*Lp) matrix; small params stay f32."""

    def pad_cols(a, width):
        return jnp.pad(a, ((0, 0), (0, width - a.shape[1])))

    wvu = jnp.concatenate(
        [pad_cols(params["wv"], lp), pad_cols(params["wu"], lp)],
        axis=1).astype(jnp.bfloat16)                          # (M, 2Lp) bf16
    bvu = jnp.concatenate(
        [pad_cols(params["bv"], lp), pad_cols(params["bu"], lp)],
        axis=1).astype(jnp.float32)                           # (1, 2Lp) f32
    ww_row = pad_cols(params["ww"].T, lp).astype(jnp.float32)  # (1, Lp)
    wc_row = params["wc"].T.astype(jnp.float32)                # (1, M)
    scalars = jnp.concatenate(
        [params["bw"].reshape(-1), params["bc"].reshape(-1)]
    ).astype(jnp.float32)                                      # (2,) [bw, bc] -> SMEM
    return wvu, bvu, ww_row, wc_row, scalars


def _vmem_limit_bytes(tile_n, m, lp):
    """Size the scoped-VMEM limit from the actual buffers (v7x-safe ceiling)."""
    x_buf = 2 * tile_n * m * 2                  # double-buffered bf16 x tiles
    a_buf = 2 * tile_n * 4                      # double-buffered f32 logit blocks
    weights = m * 2 * lp * 2 + (3 * lp + m + 8) * 4
    interm = 3 * tile_n * 2 * lp * 4            # h / activations f32 temporaries
    need = x_buf + a_buf + weights + interm + m * 4 + 4096
    return int(min(max(2 * need, 16 * 1024 * 1024), 64 * 1024 * 1024))


def gated_attention_forward(x, params, *, tile_n=1024):
    """x: (1, N, M)  ->  (Y_prob (1,1), Y_hat (1,1), A (1,N)).

    tile_n is the primary tuning knob: sweep 512-2048 on v6e, 512-1024 on
    v5e/v7x (VMEM budget is derived automatically from tile_n / M / L).
    """
    x2d = jnp.squeeze(x, axis=0)                             # (N, M)
    n, m = x2d.shape
    assert n >= 1
    assert params["ww"].shape[1] == 1, "ATTENTION_BRANCHES > 1 not supported"
    l = params["wv"].shape[1]
    lp = ((l + 127) // 128) * 128                            # pad L to lane boundary

    tile_n = max(128, (tile_n // 128) * 128)                 # lane/MXU aligned
    tile_n = min(tile_n, ((n + 127) // 128) * 128)           # don't over-pad small bags
    num_tiles = pl.cdiv(n, tile_n)
    n_pad = num_tiles * tile_n                               # n_pad - n < tile_n

    x_bf = jnp.pad(x2d, ((0, n_pad - n), (0, 0))).astype(jnp.bfloat16)
    wvu, bvu, ww_row, wc_row, scalars = pack_params(params, lp)

    kernel = _make_kernel(n, tile_n, lp, m)

    y_prob, y_hat, a_logits, m_fin, l_fin = pl.pallas_call(
        kernel,
        out_shape=(
            jax.ShapeDtypeStruct((1, 1), jnp.float32),       # Y_prob
            jax.ShapeDtypeStruct((1, 1), jnp.float32),       # Y_hat
            jax.ShapeDtypeStruct((1, n_pad), jnp.float32),   # raw attention logits
            jax.ShapeDtypeStruct((1, 1), jnp.float32),       # final softmax max m
            jax.ShapeDtypeStruct((1, 1), jnp.float32),       # final softmax denom l
        ),
        grid_spec=pltpu.PrefetchScalarGridSpec(
            num_scalar_prefetch=0,
            grid=(num_tiles,),
            in_specs=[
                pl.BlockSpec((tile_n, m), lambda i: (i, 0)),        # x: streamed
                pl.BlockSpec((m, 2 * lp), lambda i: (0, 0)),        # fused V|U weight
                pl.BlockSpec((1, 2 * lp), lambda i: (0, 0)),        # fused V|U bias
                pl.BlockSpec((1, lp), lambda i: (0, 0)),            # attention_w row
                pl.BlockSpec((1, m), lambda i: (0, 0)),             # classifier row
                pl.BlockSpec(memory_space=pltpu.MemorySpace.SMEM),  # [bw, bc]
            ],
            out_specs=(
                pl.BlockSpec((1, 1), lambda i: (0, 0)),
                pl.BlockSpec((1, 1), lambda i: (0, 0)),
                pl.BlockSpec((1, tile_n), lambda i: (0, i)),   # streamed logit blocks
                pl.BlockSpec((1, 1), lambda i: (0, 0)),        # m accumulator
                pl.BlockSpec((1, 1), lambda i: (0, 0)),        # l accumulator
            ),
            scratch_shapes=[
                pltpu.VMEM((1, m), jnp.float32),   # running weighted sum z
            ],
        ),
        compiler_params=pltpu.CompilerParams(
            # Grid axis carries the online-softmax state (m, l, z accumulators):
            # it MUST stay "arbitrary" (do not mark parallel / shard without
            # restructuring the carry).
            dimension_semantics=("arbitrary",),
            vmem_limit_bytes=_vmem_limit_bytes(tile_n, m, lp),
        ),
    )(x_bf, wvu, bvu, ww_row, wc_row, scalars)

    # Exact f32 softmax normalization in the wrapper (one fused elementwise op);
    # padded logits sit at -1e30 and underflow to exactly 0 before the slice.
    a = jnp.exp(a_logits - m_fin) / l_fin
    return y_prob, y_hat, a[:, :n]


def init_params(key, M, L, K):
    """Deterministic PyTorch-style uniform init; weights stored (in, out)."""
    ks = jax.random.split(key, 8)

    def lin(kw, kb, fan_in, fan_out):
        bound = 1.0 / math.sqrt(fan_in)
        w = jax.random.uniform(kw, (fan_in, fan_out), jnp.float32, -bound, bound)
        b = jax.random.uniform(kb, (1, fan_out), jnp.float32, -bound, bound)
        return w, b

    wv, bv = lin(ks[0], ks[1], M, L)          # attention_V linear
    wu, bu = lin(ks[2], ks[3], M, L)          # attention_U linear
    ww, bw = lin(ks[4], ks[5], L, K)          # attention_w
    wc, bc = lin(ks[6], ks[7], M * K, 1)      # classifier (K == 1)
    return dict(wv=wv, bv=bv, wu=wu, bu=bu, ww=ww, bw=bw, wc=wc, bc=bc)


def reference_forward(x, params):
    x2d = jnp.squeeze(x, axis=0).astype(jnp.float32)
    av = jnp.tanh(x2d @ params["wv"] + params["bv"])
    au = jax.nn.sigmoid(x2d @ params["wu"] + params["bu"])
    a = (av * au) @ params["ww"] + params["bw"]            # (N, 1)
    a = a.T                                                # (1, N)
    a = jax.nn.softmax(a, axis=1)
    z = a @ x2d                                            # (1, M)
    y_prob = jax.nn.sigmoid(z @ params["wc"] + params["bc"])
    y_hat = (y_prob >= 0.5).astype(jnp.float32)
    return y_prob, y_hat, a


if __name__ == "__main__":
    M, L, K = 64, 32, 1      # feature dim, attention dim, attention branches
    N = 300                  # not a multiple of 128 -> exercises ragged-tile masking

    key = jax.random.PRNGKey(0)
    k_x, k_p = jax.random.split(key)
    x = jax.random.normal(k_x, (1, N, M), dtype=jnp.float32)   # bag: (1, N, M)
    params = init_params(k_p, M, L, K)

    y_prob, y_hat, a = gated_attention_forward(x, params)
    jax.block_until_ready((y_prob, y_hat, a))

    # Sanity check against a pure-JAX f32 reference (kernel streams x in bf16,
    # so tolerances reflect bf16 input quantization).
    y_prob_r, y_hat_r, a_r = reference_forward(x, params)
    assert y_prob.shape == (1, 1) and y_hat.shape == (1, 1) and a.shape == (1, N)
    assert jnp.allclose(y_prob, y_prob_r, atol=1e-2), (y_prob, y_prob_r)
    assert jnp.allclose(a, a_r, atol=2e-3), float(jnp.abs(a - a_r).max())
    # Normalization is exact f32 in the wrapper now -> A sums to 1 tightly.
    assert jnp.allclose(jnp.sum(a), 1.0, atol=1e-3), float(jnp.sum(a))
    # Y_hat must be consistent with the kernel's own Y_prob (thresholding at 0.5
    # may legitimately differ from the f32 reference when Y_prob is ~0.5).
    assert jnp.array_equal(y_hat, (y_prob >= 0.5).astype(jnp.float32))

    print("KERNEL_OK")
</pallas_src>

<mosaic_0001>
module attributes {stable_mosaic.version = 11 : i64} {
  func.func @kernel(%arg0: i32, %arg1: memref<384x64xbf16, #tpu.memory_space<vmem>>, %arg2: memref<64x256xbf16, #tpu.memory_space<vmem>>, %arg3: memref<1x256xf32, #tpu.memory_space<vmem>>, %arg4: memref<1x128xf32, #tpu.memory_space<vmem>>, %arg5: memref<1x64xf32, #tpu.memory_space<vmem>>, %arg6: memref<2xf32, #tpu.memory_space<smem>>, %arg7: memref<1x1xf32, #tpu.memory_space<vmem>>, %arg8: memref<1x1xf32, #tpu.memory_space<vmem>>, %arg9: memref<1x384xf32, #tpu.memory_space<vmem>>, %arg10: memref<1x1xf32, #tpu.memory_space<vmem>>, %arg11: memref<1x1xf32, #tpu.memory_space<vmem>>, %arg12: memref<1x64xf32, #tpu.memory_space<vmem>>) attributes {dimension_semantics = [#tpu.dimension_semantics<arbitrary>], iteration_bounds = array<i64: 1>, scalar_prefetch = 0 : i64, scratch_operands = 1 : i64, tpu.core_type = #tpu.core_type<tc>, window_params = [{transform_indices = @transform_0, window_bounds = array<i64: 384, 64>}, {pipeline_mode = #tpu.pipeline_mode<synchronous>, transform_indices = @transform_1, window_bounds = array<i64: 64, 256>}, {pipeline_mode = #tpu.pipeline_mode<synchronous>, transform_indices = @transform_2, window_bounds = array<i64: 1, 256>}, {pipeline_mode = #tpu.pipeline_mode<synchronous>, transform_indices = @transform_3, window_bounds = array<i64: 1, 128>}, {pipeline_mode = #tpu.pipeline_mode<synchronous>, transform_indices = @transform_4, window_bounds = array<i64: 1, 64>}, {transform_indices = @transform_5, window_bounds = array<i64: 2>}, {pipeline_mode = #tpu.pipeline_mode<synchronous>, transform_indices = @transform_6, window_bounds = array<i64: 1, 1>}, {pipeline_mode = #tpu.pipeline_mode<synchronous>, transform_indices = @transform_7, window_bounds = array<i64: 1, 1>}, {transform_indices = @transform_8, window_bounds = array<i64: 1, 384>}, {pipeline_mode = #tpu.pipeline_mode<synchronous>, transform_indices = @transform_9, window_bounds = array<i64: 1, 1>}, {pipeline_mode = #tpu.pipeline_mode<synchronous>, transform_indices = @transform_10, window_bounds = array<i64: 1, 1>}]} {
    %c0_i32 = arith.constant 0 : i32
    %0 = arith.cmpi eq, %arg0, %c0_i32 : i32
    %1 = arith.extui %0 : i1 to i32
    %c0_i32_0 = arith.constant 0 : i32
    %2 = arith.cmpi ne, %1, %c0_i32_0 : i32
    scf.if %2 {
      %cst_31 = arith.constant -1.000000e+30 : f32
      %58 = vector.broadcast %cst_31 : f32 to vector<1x1xf32>
      %c0_32 = arith.constant 0 : index
      %c0_33 = arith.constant 0 : index
      %59 = vector.load %arg10[%c0_32, %c0_33] : memref<1x1xf32, #tpu.memory_space<vmem>>, vector<1x1xf32>
      tpu.vector_store %arg10[%c0_32, %c0_33], %58 {strides = array<i32>} : memref<1x1xf32, #tpu.memory_space<vmem>>, vector<1x1xf32>,
      %cst_34 = arith.constant 0.000000e+00 : f32
      %60 = vector.broadcast %cst_34 : f32 to vector<1x1xf32>
      %c0_35 = arith.constant 0 : index
      %c0_36 = arith.constant 0 : index
      %61 = vector.load %arg11[%c0_35, %c0_36] : memref<1x1xf32, #tpu.memory_space<vmem>>, vector<1x1xf32>
      tpu.vector_store %arg11[%c0_35, %c0_36], %60 {strides = array<i32>} : memref<1x1xf32, #tpu.memory_space<vmem>>, vector<1x1xf32>,
      %cst_37 = arith.constant 0.000000e+00 : f32
      %62 = vector.broadcast %cst_37 : f32 to vector<1x64xf32>
      %c0_38 = arith.constant 0 : index
      %c0_39 = arith.constant 0 : index
      %63 = vector.load %arg12[%c0_38, %c0_39] : memref<1x64xf32, #tpu.memory_space<vmem>>, vector<1x64xf32>
      tpu.vector_store %arg12[%c0_38, %c0_39], %62 {strides = array<i32>} : memref<1x64xf32, #tpu.memory_space<vmem>>, vector<1x64xf32>,
    } else {
    }
    %c0 = arith.constant 0 : index
    %c0_1 = arith.constant 0 : index
    %3 = vector.load %arg1[%c0, %c0_1] : memref<384x64xbf16, #tpu.memory_space<vmem>>, vector<384x64xbf16>
    %c0_2 = arith.constant 0 : index
    %4 = memref.load %arg6[%c0_2] : memref<2xf32, #tpu.memory_space<smem>>
    %c0_3 = arith.constant 0 : index
    %c0_4 = arith.constant 0 : index
    %5 = vector.load %arg2[%c0_3, %c0_4] : memref<64x256xbf16, #tpu.memory_space<vmem>>, vector<64x256xbf16>
    %cst = arith.constant dense<0.000000e+00> : vector<384x256xf32>
    %6 = tpu.matmul %3, %5, %cst {dimension_numbers = #tpu.dot_dimension_numbers<[1], [0], [0], [1], [0, 0, 1, 1], [], []>} : vector<384x64xbf16>, vector<64x256xbf16>, vector<384x256xf32> -> vector<384x256xf32>
    %c0_5 = arith.constant 0 : index
    %c0_6 = arith.constant 0 : index
    %7 = vector.load %arg3[%c0_5, %c0_6] : memref<1x256xf32, #tpu.memory_space<vmem>>, vector<1x256xf32>
    %8 = vector.broadcast %7 : vector<1x256xf32> to vector<384x256xf32>
    %9 = arith.addf %6, %8 : vector<384x256xf32>
    %10 = vector.extract_strided_slice %9 {offsets = [0, 0], sizes = [384, 128], strides = [1, 1]} : vector<384x256xf32> to vector<384x128xf32>
    %11 = math.tanh %10 : vector<384x128xf32>
    %12 = vector.extract_strided_slice %9 {offsets = [0, 128], sizes = [384, 128], strides = [1, 1]} : vector<384x256xf32> to vector<384x128xf32>
    %13 = arith.negf %12 : vector<384x128xf32>
    %14 = math.exp %13 : vector<384x128xf32>
    %cst_7 = arith.constant 1.000000e+00 : f32
    %15 = vector.broadcast %cst_7 : f32 to vector<384x128xf32>
    %16 = arith.addf %15, %14 : vector<384x128xf32>
    %17 = arith.divf %15, %16 : vector<384x128xf32>
    %18 = arith.mulf %11, %17 : vector<384x128xf32>
    %c0_8 = arith.constant 0 : index
    %c0_9 = arith.constant 0 : index
    %19 = vector.load %arg4[%c0_8, %c0_9] : memref<1x128xf32, #tpu.memory_space<vmem>>, vector<1x128xf32>
    %cst_10 = arith.constant dense<0.000000e+00> : vector<1x384xf32>
    %20 = tpu.matmul %19, %18, %cst_10 {dimension_numbers = #tpu.dot_dimension_numbers<[1], [1], [0], [0], [0, 0, 1, 0], [], []>} : vector<1x128xf32>, vector<384x128xf32>, vector<1x384xf32> -> vector<1x384xf32>
    %21 = vector.broadcast %4 : f32 to vector<1x384xf32>
    %22 = arith.addf %20, %21 : vector<1x384xf32>
    %c384_i32 = arith.constant 384 : i32
    %23 = arith.muli %arg0, %c384_i32 : i32
    %24 = tpu.iota {dimensions = array<i32: 1>} : vector<1x384xi32>
    %25 = vector.broadcast %23 : i32 to vector<1x384xi32>
    %26 = arith.addi %25, %24 : vector<1x384xi32>
    %c300_i32 = arith.constant 300 : i32
    %27 = vector.broadcast %c300_i32 : i32 to vector<1x384xi32>
    %28 = arith.cmpi slt, %26, %27 : vector<1x384xi32>
    %cst_11 = arith.constant -1.000000e+30 : f32
    %29 = vector.broadcast %cst_11 : f32 to vector<1x384xf32>
    %30 = arith.select %28, %22, %29 : vector<1x384xi1>, vector<1x384xf32>
    %c0_12 = arith.constant 0 : index
    %c0_13 = arith.constant 0 : index
    %31 = vector.load %arg9[%c0_12, %c0_13] : memref<1x384xf32, #tpu.memory_space<vmem>>, vector<1x384xf32>
    tpu.vector_store %arg9[%c0_12, %c0_13], %30 {strides = array<i32>} : memref<1x384xf32, #tpu.memory_space<vmem>>, vector<1x384xf32>,
    %c0_14 = arith.constant 0 : index
    %c0_15 = arith.constant 0 : index
    %32 = vector.load %arg10[%c0_14, %c0_15] : memref<1x1xf32, #tpu.memory_space<vmem>>, vector<1x1xf32>
    %cst_16 = arith.constant dense<0xFF800000> : vector<1xf32>
    %33 = vector.multi_reduction <maximumf>, %30, %cst_16 [1] : vector<1x384xf32> to vector<1xf32>
    %34 = vector.shape_cast %33 : vector<1xf32> to vector<1x1xf32>
    %35 = arith.maximumf %32, %34 : vector<1x1xf32>
    %36 = arith.subf %32, %35 : vector<1x1xf32>
    %37 = math.exp %36 : vector<1x1xf32>
    %38 = vector.broadcast %35 : vector<1x1xf32> to vector<1x384xf32>
    %39 = arith.subf %30, %38 : vector<1x384xf32>
    %40 = math.exp %39 : vector<1x384xf32>
    %c0_17 = arith.constant 0 : index
    %c0_18 = arith.constant 0 : index
    %41 = vector.load %arg11[%c0_17, %c0_18] : memref<1x1xf32, #tpu.memory_space<vmem>>, vector<1x1xf32>
    %42 = arith.mulf %37, %41 : vector<1x1xf32>
    %cst_19 = arith.constant dense<0.000000e+00> : vector<1xf32>
    %43 = vector.multi_reduction <add>, %40, %cst_19 [1] : vector<1x384xf32> to vector<1xf32>
    %44 = vector.shape_cast %43 : vector<1xf32> to vector<1x1xf32>
    %45 = arith.addf %42, %44 : vector<1x1xf32>
    %c0_20 = arith.constant 0 : index
    %c0_21 = arith.constant 0 : index
    %46 = vector.load %arg11[%c0_20, %c0_21] : memref<1x1xf32, #tpu.memory_space<vmem>>, vector<1x1xf32>
    tpu.vector_store %arg11[%c0_20, %c0_21], %45 {strides = array<i32>} : memref<1x1xf32, #tpu.memory_space<vmem>>, vector<1x1xf32>,
    %c0_22 = arith.constant 0 : index
    %c0_23 = arith.constant 0 : index
    %47 = vector.load %arg12[%c0_22, %c0_23] : memref<1x64xf32, #tpu.memory_space<vmem>>, vector<1x64xf32>
    %48 = vector.broadcast %37 : vector<1x1xf32> to vector<1x64xf32>
    %49 = arith.mulf %48, %47 : vector<1x64xf32>
    %50 = arith.truncf %40 : vector<1x384xf32> to vector<1x384xbf16>
    %cst_24 = arith.constant dense<0.000000e+00> : vector<1x64xf32>
    %51 = tpu.matmul %50, %3, %cst_24 {dimension_numbers = #tpu.dot_dimension_numbers<[1], [0], [0], [1], [0, 0, 1, 1], [], []>} : vector<1x384xbf16>, vector<384x64xbf16>, vector<1x64xf32> -> vector<1x64xf32>
    %52 = arith.addf %49, %51 : vector<1x64xf32>
    %c0_25 = arith.constant 0 : index
    %c0_26 = arith.constant 0 : index
    %53 = vector.load %arg12[%c0_25, %c0_26] : memref<1x64xf32, #tpu.memory_space<vmem>>, vector<1x64xf32>
    tpu.vector_store %arg12[%c0_25, %c0_26], %52 {strides = array<i32>} : memref<1x64xf32, #tpu.memory_space<vmem>>, vector<1x64xf32>,
    %c0_27 = arith.constant 0 : index
    %c0_28 = arith.constant 0 : index
    %54 = vector.load %arg10[%c0_27, %c0_28] : memref<1x1xf32, #tpu.memory_space<vmem>>, vector<1x1xf32>
    tpu.vector_store %arg10[%c0_27, %c0_28], %35 {strides = array<i32>} : memref<1x1xf32, #tpu.memory_space<vmem>>, vector<1x1xf32>,
    %c0_i32_29 = arith.constant 0 : i32
    %55 = arith.cmpi eq, %arg0, %c0_i32_29 : i32
    %56 = arith.extui %55 : i1 to i32
    %c0_i32_30 = arith.constant 0 : i32
    %57 = arith.cmpi ne, %56, %c0_i32_30 : i32
    scf.if %57 {
      %c0_31 = arith.constant 0 : index
      %c0_32 = arith.constant 0 : index
      %58 = vector.load %arg12[%c0_31, %c0_32] : memref<1x64xf32, #tpu.memory_space<vmem>>, vector<1x64xf32>
      %c0_33 = arith.constant 0 : index
      %c0_34 = arith.constant 0 : index
      %59 = vector.load %arg11[%c0_33, %c0_34] : memref<1x1xf32, #tpu.memory_space<vmem>>, vector<1x1xf32>
      %60 = vector.broadcast %59 : vector<1x1xf32> to vector<1x64xf32>
      %61 = arith.divf %58, %60 : vector<1x64xf32>
      %c0_35 = arith.constant 0 : index
      %c0_36 = arith.constant 0 : index
      %62 = vector.load %arg5[%c0_35, %c0_36] : memref<1x64xf32, #tpu.memory_space<vmem>>, vector<1x64xf32>
      %63 = arith.mulf %61, %62 : vector<1x64xf32>
      %cst_37 = arith.constant dense<0.000000e+00> : vector<1xf32>
      %64 = vector.multi_reduction <add>, %63, %cst_37 [1] : vector<1x64xf32> to vector<1xf32>
      %65 = vector.shape_cast %64 : vector<1xf32> to vector<1x1xf32>
      %c1 = arith.constant 1 : index
      %66 = memref.load %arg6[%c1] : memref<2xf32, #tpu.memory_space<smem>>
      %67 = vector.broadcast %66 : f32 to vector<1x1xf32>
      %68 = arith.addf %65, %67 : vector<1x1xf32>
      %69 = arith.negf %68 : vector<1x1xf32>
      %70 = math.exp %69 : vector<1x1xf32>
      %cst_38 = arith.constant 1.000000e+00 : f32
      %71 = vector.broadcast %cst_38 : f32 to vector<1x1xf32>
      %72 = arith.addf %71, %70 : vector<1x1xf32>
      %73 = arith.divf %71, %72 : vector<1x1xf32>
      %c0_39 = arith.constant 0 : index
      %c0_40 = arith.constant 0 : index
      %74 = vector.load %arg7[%c0_39, %c0_40] : memref<1x1xf32, #tpu.memory_space<vmem>>, vector<1x1xf32>
      tpu.vector_store %arg7[%c0_39, %c0_40], %73 {strides = array<i32>} : memref<1x1xf32, #tpu.memory_space<vmem>>, vector<1x1xf32>,
      %cst_41 = arith.constant 5.000000e-01 : f32
      %75 = vector.broadcast %cst_41 : f32 to vector<1x1xf32>
      %76 = arith.cmpf oge, %73, %75 : vector<1x1xf32>
      %77 = arith.extui %76 : vector<1x1xi1> to vector<1x1xi32>
      %78 = arith.sitofp %77 : vector<1x1xi32> to vector<1x1xf32>
      %c0_42 = arith.constant 0 : index
      %c0_43 = arith.constant 0 : index
      %79 = vector.load %arg8[%c0_42, %c0_43] : memref<1x1xf32, #tpu.memory_space<vmem>>, vector<1x1xf32>
      tpu.vector_store %arg8[%c0_42, %c0_43], %78 {strides = array<i32>} : memref<1x1xf32, #tpu.memory_space<vmem>>, vector<1x1xf32>,
    } else {
    }
    return
  }
  func.func @transform_0(%arg0: i32) -> (i32, i32) {
    %c0_i32 = arith.constant 0 : i32
    %c0_i32_0 = arith.constant 0 : i32
    return %arg0, %c0_i32 : i32, i32
  }
  func.func @transform_1(%arg0: i32) -> (i32, i32) {
    %c0_i32 = arith.constant 0 : i32
    %c0_i32_0 = arith.constant 0 : i32
    %c0_i32_1 = arith.constant 0 : i32
    return %c0_i32, %c0_i32_0 : i32, i32
  }
  func.func @transform_2(%arg0: i32) -> (i32, i32) {
    %c0_i32 = arith.constant 0 : i32
    %c0_i32_0 = arith.constant 0 : i32
    %c0_i32_1 = arith.constant 0 : i32
    return %c0_i32, %c0_i32_0 : i32, i32
  }
  func.func @transform_3(%arg0: i32) -> (i32, i32) {
    %c0_i32 = arith.constant 0 : i32
    %c0_i32_0 = arith.constant 0 : i32
    %c0_i32_1 = arith.constant 0 : i32
    return %c0_i32, %c0_i32_0 : i32, i32
  }
  func.func @transform_4(%arg0: i32) -> (i32, i32) {
    %c0_i32 = arith.constant 0 : i32
    %c0_i32_0 = arith.constant 0 : i32
    %c0_i32_1 = arith.constant 0 : i32
    return %c0_i32, %c0_i32_0 : i32, i32
  }
  func.func @transform_5(%arg0: i32) -> i32 {
    %c0_i32 = arith.constant 0 : i32
    %c0_i32_0 = arith.constant 0 : i32
    return %c0_i32 : i32
  }
  func.func @transform_6(%arg0: i32) -> (i32, i32) {
    %c0_i32 = arith.constant 0 : i32
    %c0_i32_0 = arith.constant 0 : i32
    %c0_i32_1 = arith.constant 0 : i32
    return %c0_i32, %c0_i32_0 : i32, i32
  }
  func.func @transform_7(%arg0: i32) -> (i32, i32) {
    %c0_i32 = arith.constant 0 : i32
    %c0_i32_0 = arith.constant 0 : i32
    %c0_i32_1 = arith.constant 0 : i32
    return %c0_i32, %c0_i32_0 : i32, i32
  }
  func.func @transform_8(%arg0: i32) -> (i32, i32) {
    %c0_i32 = arith.constant 0 : i32
    %c0_i32_0 = arith.constant 0 : i32
    return %c0_i32, %arg0 : i32, i32
  }
  func.func @transform_9(%arg0: i32) -> (i32, i32) {
    %c0_i32 = arith.constant 0 : i32
    %c0_i32_0 = arith.constant 0 : i32
    %c0_i32_1 = arith.constant 0 : i32
    return %c0_i32, %c0_i32_0 : i32, i32
  }
  func.func @transform_10(%arg0: i32) -> (i32, i32) {
    %c0_i32 = arith.constant 0 : i32
    %c0_i32_0 = arith.constant 0 : i32
    %c0_i32_1 = arith.constant 0 : i32
    return %c0_i32, %c0_i32_0 : i32, i32
  }
}

</mosaic_0001>

<bundles_post_ra>
// kernel: tpu_custom_call.1
= control target key start
LH: loop header
LB: loop body
LE: loop exit
PB: predicated region body
PF: predicated region fallthrough
CT: control target
= control target key end

     0   :  { %16 = vsyncpa [#allocation5], 0  ;;  %s2857_s0 = inlined_call_operand.vmem [shape: bf16[384,64], index: 0, kind: input, shape index: {}]   ;;  %s2858_s1 = inlined_call_operand.vmem [shape: bf16[64,256], index: 1, kind: input, shape index: {}]   ;;  %s2859_s2 = inlined_call_operand.vmem [shape: f32[1,256], index: 2, kind: input, shape index: {}]   ;;  %s2860_s3 = inlined_call_operand.vmem [shape: f32[1,128], index: 3, kind: input, shape index: {}]   ;;  %s2861_s4 = inlined_call_operand.vmem [shape: f32[1,64], index: 4, kind: input, shape index: {}]   ;;  %s2862_s5 = inlined_call_operand.vmem [shape: f32[2], index: 5, kind: input, shape index: {}]   ;;  %s2863_s6 = inlined_call_operand.hbm [shape: f32[1,1], index: 6, kind: output, shape index: {0}]   ;;  %s2864_s7 = inlined_call_operand.hbm [shape: f32[1,1], index: 7, kind: output, shape index: {1}]   ;;  %s2865_s8 = inlined_call_operand.hbm [shape: f32[1,384], index: 8, kind: output, shape index: {2}]   ;;  %s2866_s9 = inlined_call_operand.hbm [shape: f32[1,1], index: 9, kind: output, shape index: {3}]   ;;  %s2867_s10 = inlined_call_operand.hbm [shape: f32[1,1], index: 10, kind: output, shape index: {4}]  }
   0x1   :  { %17 = vsyncpa [#allocation4], 0 }
   0x2   :  { %18 = vsyncpa [#allocation8], 0 }
   0x3   :  { %19 = vsyncpa [#allocation11], 0  ;;  %s36_s15 = sshll.u32 %s2862_s5, 4  ;;  %s37_s15 = int_to_ptr.vmem [resolvable:$true] %s36_s15 }
   0x4   :  { %s2091_s16 = scalar_lea.vmem %s37_s15, 16  ;;  %p2096_p1 = scmp.lt.s32.totalorder %s37_s15, %s37_s15 }
   0x5   :  { %p2092_p0 = scmp.ne.s32.totalorder %s37_s15, %s2091_s16  ;;  %p2097_p2 = scmp.lt.s32.totalorder %s2091_s16, %s2091_s16 }
   0x7   :  { %p2098_p3 = por %p2097_p2, %p2096_p1 }
   0x9   :  { %p2099_p4 = pnand %p2098_p3, %p2092_p0 }
   0xb   :  { %2102 = shalt.err (!%p2099_p4)
}
   0xc   :  { %s2211_s17 = smov [#allocation3]  }
   0xd   :  { %39 = dma.vmem_to_smem %s37_s15, 16, %s2211_s17, [#allocation5]  }
   0xe   :  { %2203 = dma.done.wait [#allocation5], 16  }
   0xf   :  { %2204 = vsyncadd [#allocation5], 4294967280 }
  0x10   :  { %43 = sfence }
  0x11   :  { %v1729_v0 = vld [vmem:[%s2858_s1 + $0x34] ss:$8 sps:$4 sm:$0xff]   ;;  %v1731_v1 = vld [vmem:[%s2858_s1 + $0x30] ss:$8 sps:$4 sm:$0xff]   ;;  %v2212_v2 = vmov 0   ;;  %v1741_v9 = vld [vmem:[%s2857_s0] sm:$0xff]   ;;  %v113_v33 = vlaneseq }
  0x12   :  { %388 = vmatprep.mubr.bf16.mxu0 %v2212_v2  ;;  %1727 = vset.pattern.permute.xlu0 %v2212_v2  ;;  %v1732_v3 = vld [vmem:[%s2858_s1 + $0x24] ss:$8 sps:$4 sm:$0xff]   ;;  %v1734_v4 = vld [vmem:[%s2858_s1 + $0x20] ss:$8 sps:$4 sm:$0xff]   ;;  %v1735_v5 = vld [vmem:[%s2858_s1 + $0x14] ss:$8 sps:$4 sm:$0xff]  }
  0x13   :  { %364 = vmatprep.subr.bf16.mxu0 %v1729_v0  ;;  %1728 = vset.pattern.permute.xlu1 %v2212_v2  ;;  %v1737_v6 = vld [vmem:[%s2858_s1 + $0x10] ss:$8 sps:$4 sm:$0xff]   ;;  %v1738_v7 = vld [vmem:[%s2858_s1 + $0x4] ss:$8 sps:$4 sm:$0xff]   ;;  %v1740_v8 = vld [vmem:[%s2858_s1] ss:$8 sps:$4 sm:$0xff]  }
  0x14   :  { %365 = vmatpush1.bf16.msra.mxu0 %v1731_v1  ;;  %vm283_vm0 = vcmask 523264   ;;  %v1742_v10 = vld [vmem:[%s2857_s0 + $0x8] sm:$0xff]   ;;  %v1743_v11 = vld [vmem:[%s2857_s0 + $0x10] sm:$0xff]   ;;  %v1744_v12 = vld [vmem:[%s2857_s0 + $0x18] sm:$0xff]   ;;  %v2427_v34 = vshrl.u32 %v113_v33, 7  ;;  %vm2214_vm1 = vmmov 0  }
  0x15   :  { %366 = vmatprep.subr.bf16.mxu0 %v1732_v3  ;;  %v1745_v13 = vld [vmem:[%s2857_s0 + $0x20] sm:$0xff]   ;;  %v1746_v14 = vld [vmem:[%s2857_s0 + $0x28] sm:$0xff]   ;;  %v1747_v15 = vld [vmem:[%s2857_s0 + $0x30] sm:$0xff]   ;;  %s102_s25 = sld [smem:[#allocation3]]  ;;  %vm1204_vm2 = vcmask 1040384   ;;  %vm1200_vm4 = vcmp.lt.s32.totalorder %v113_v33, 384 }
  0x16   :  { %v1748_v16 = vld [vmem:[%s2857_s0 + $0x38] sm:$0xff]   ;;  %v1749_v17 = vld [vmem:[%s2857_s0 + $0x40] sm:$0xff]   ;;  %v1750_v18 = vld [vmem:[%s2857_s0 + $0x48] sm:$0xff]   ;;  %v119_v35 = vsub.s32 1, %v2427_v34  ;;  %v2438_v47 = vsub.s32 0, %v2427_v34  ;;  %vm49_vm5 = vcmask 0  }
  0x17   :  { %v1751_v19 = vld [vmem:[%s2857_s0 + $0x50] sm:$0xff]   ;;  %v1752_v20 = vld [vmem:[%s2857_s0 + $0x58] sm:$0xff]   ;;  %v1753_v21 = vld [vmem:[%s2857_s0 + $0x60] sm:$0xff]   ;;  %vm52_vm6 = vcmask 516096   ;;  %s2217_s20 = smov [#allocation10]  }
  0x18   :  { %367 = vmatpush1.bf16.msra.mxu0 %v1734_v4  ;;  %v1754_v22 = vld [vmem:[%s2857_s0 + $0x68] sm:$0xff]   ;;  %v1755_v23 = vld [vmem:[%s2857_s0 + $0x70] sm:$0xff]   ;;  %v1756_v24 = vld [vmem:[%s2857_s0 + $0x78] sm:$0xff]   ;;  %s1439_s21 = sshll.u32 %s2217_s20, 4  ;;  %s1440_s21 = int_to_ptr.vmem [resolvable:$true] %s1439_s21 }
  0x19   :  { %368 = vmatprep.subr.bf16.mxu0 %v1735_v5  ;;  %v1757_v25 = vld [vmem:[%s2857_s0 + $0x80] sm:$0xff]   ;;  %v1758_v26 = vld [vmem:[%s2857_s0 + $0x88] sm:$0xff]   ;;  %v1759_v27 = vld [vmem:[%s2857_s0 + $0x90] sm:$0xff]   ;;  %s2103_s5 = scalar_lea.vmem %s1440_s21, 16  ;;  %s2107_s22 = scalar_lea.vmem %s1440_s21, 32 }
  0x1a   :  { %v1760_v28 = vld [vmem:[%s2857_s0 + $0x98] sm:$0xff]   ;;  %v1761_v29 = vld [vmem:[%s2857_s0 + $0xa0] sm:$0xff]   ;;  %v1762_v30 = vld [vmem:[%s2857_s0 + $0xa8] sm:$0xff]   ;;  %p2104_p5 = scmp.ne.s32.totalorder %s1440_s21, %s2103_s5  ;;  %p2108_p6 = scmp.lt.s32.totalorder %s1440_s21, %s1440_s21 }
  0x1b   :  { %v1763_v31 = vld [vmem:[%s2857_s0 + $0xb0] sm:$0xff]   ;;  %v1764_v32 = vld [vmem:[%s2857_s0 + $0xb8] sm:$0xff]   ;;  %v111_v36 = vld [vmem:[%s2859_s2] sm:$0x3]  ;;  %p2109_p7 = scmp.lt.s32.totalorder %s2107_s22, %s2103_s5 }
  0x1c   :  { %369 = vmatpush1.bf16.msra.mxu0 %v1737_v6  ;;  %v2433_v37 = vrot.slane %v111_v36, %v119_v35  ;;  %v2442_v52 = vrot.slane %v111_v36, %v2438_v47 }
  0x1d   :  { %370 = vmatprep.subr.bf16.mxu0 %v1738_v7  ;;  %p2110_p8 = por %p2109_p7, %p2108_p6 }
  0x1f   :  { %p2111_p9 = pnand %p2110_p8, %p2104_p5 }
  0x20   :  { %371 = vmatpush1.bf16.msra.mxu0 %v1740_v8 }
  0x23   :  { %1504 = vmatmul.mubr.msk.bf16.vlgmr.msra.gmra.mxu0 %vm283_vm0, %v1741_v9 }
  0x24   :  { %398 = vmatprep.mubr.bf16.mxu0 %v2212_v2 }
  0x2b   :  { %1505 = vmatmul.mubr.msk.bf16.gmra.mxu0 %vm283_vm0, %v1742_v10 }
  0x2c   :  { %408 = vmatprep.mubr.bf16.mxu0 %v2212_v2 }
  0x33   :  { %1506 = vmatmul.mubr.msk.bf16.gmra.mxu0 %vm283_vm0, %v1743_v11 }
  0x34   :  { %418 = vmatprep.mubr.bf16.mxu0 %v2212_v2 }
  0x3b   :  { %1507 = vmatmul.mubr.msk.bf16.gmra.mxu0 %vm283_vm0, %v1744_v12 }
  0x3c   :  { %428 = vmatprep.mubr.bf16.mxu0 %v2212_v2 }
  0x43   :  { %1508 = vmatmul.mubr.msk.bf16.gmra.mxu0 %vm283_vm0, %v1745_v13 }
  0x44   :  { %438 = vmatprep.mubr.bf16.mxu0 %v2212_v2 }
  0x4b   :  { %1509 = vmatmul.mubr.msk.bf16.gmra.mxu0 %vm283_vm0, %v1746_v14 }
  0x4c   :  { %448 = vmatprep.mubr.bf16.mxu0 %v2212_v2 }
  0x53   :  { %1510 = vmatmul.mubr.msk.bf16.gmra.mxu0 %vm283_vm0, %v1747_v15 }
  0x54   :  { %458 = vmatprep.mubr.bf16.mxu0 %v2212_v2 }
  0x5b   :  { %1511 = vmatmul.mubr.msk.bf16.gmra.mxu0 %vm283_vm0, %v1748_v16 }
  0x5c   :  { %468 = vmatprep.mubr.bf16.mxu0 %v2212_v2 }
  0x63   :  { %1512 = vmatmul.mubr.msk.bf16.gmra.mxu0 %vm283_vm0, %v1749_v17 }
  0x64   :  { %478 = vmatprep.mubr.bf16.mxu0 %v2212_v2 }
  0x6b   :  { %1513 = vmatmul.mubr.msk.bf16.gmra.mxu0 %vm283_vm0, %v1750_v18 }
  0x6c   :  { %488 = vmatprep.mubr.bf16.mxu0 %v2212_v2 }
  0x73   :  { %1514 = vmatmul.mubr.msk.bf16.gmra.mxu0 %vm283_vm0, %v1751_v19 }
  0x74   :  { %498 = vmatprep.mubr.bf16.mxu0 %v2212_v2 }
  0x7b   :  { %1515 = vmatmul.mubr.msk.bf16.gmra.mxu0 %vm283_vm0, %v1752_v20 }
  0x7c   :  { %508 = vmatprep.mubr.bf16.mxu0 %v2212_v2 }
  0x83   :  { %1516 = vmatmul.mubr.msk.bf16.gmra.mxu0 %vm283_vm0, %v1753_v21 }
  0x84   :  { %518 = vmatprep.mubr.bf16.mxu0 %v2212_v2 }
  0x8b   :  { %1517 = vmatmul.mubr.msk.bf16.gmra.mxu0 %vm283_vm0, %v1754_v22 }
  0x8c   :  { %528 = vmatprep.mubr.bf16.mxu0 %v2212_v2 }
  0x93   :  { %1518 = vmatmul.mubr.msk.bf16.gmra.mxu0 %vm283_vm0, %v1755_v23 }
  0x94   :  { %538 = vmatprep.mubr.bf16.mxu0 %v2212_v2 }
  0x9b   :  { %1519 = vmatmul.mubr.msk.bf16.gmra.mxu0 %vm283_vm0, %v1756_v24 }
  0x9c   :  { %548 = vmatprep.mubr.bf16.mxu0 %v2212_v2 }
  0xa3   :  { %1520 = vmatmul.mubr.msk.bf16.gmra.mxu0 %vm283_vm0, %v1757_v25 }
  0xa4   :  { %558 = vmatprep.mubr.bf16.mxu0 %v2212_v2 }
  0xab   :  { %1521 = vmatmul.mubr.msk.bf16.gmra.mxu0 %vm283_vm0, %v1758_v26 }
  0xac   :  { %568 = vmatprep.mubr.bf16.mxu0 %v2212_v2 }
  0xb3   :  { %1522 = vmatmul.mubr.msk.bf16.gmra.mxu0 %vm283_vm0, %v1759_v27 }
  0xb4   :  { %578 = vmatprep.mubr.bf16.mxu0 %v2212_v2 }
  0xbb   :  { %1523 = vmatmul.mubr.msk.bf16.gmra.mxu0 %vm283_vm0, %v1760_v28 }
  0xbc   :  { %588 = vmatprep.mubr.bf16.mxu0 %v2212_v2 }
  0xc3   :  { %1524 = vmatmul.mubr.msk.bf16.gmra.mxu0 %vm283_vm0, %v1761_v29 }
  0xc4   :  { %598 = vmatprep.mubr.bf16.mxu0 %v2212_v2 }
  0xcb   :  { %1525 = vmatmul.mubr.msk.bf16.gmra.mxu0 %vm283_vm0, %v1762_v30 }
  0xcc   :  { %608 = vmatprep.mubr.bf16.mxu0 %v2212_v2 }
  0xd3   :  { %1526 = vmatmul.mubr.msk.bf16.gmra.mxu0 %vm283_vm0, %v1763_v31 }
  0xd4   :  { %618 = vmatprep.mubr.bf16.mxu0 %v2212_v2 }
  0xdb   :  { %1527 = vmatmul.mubr.msk.bf16.gmra.mxu0 %vm283_vm0, %v1764_v32 }
  0xe3   :  { %v390_v38 = vpop.f32.mrf.mxu0 }
  0xe4   :  { %v391_v57 = vadd.f32 %v390_v38, %v2442_v52 }
  0xe5   :  { %v392_v39 = vpop.f32.mrf.mxu0 }
  0xe6   :  { %v393_v40 = vadd.f32 %v392_v39, %v2433_v37 }
  0xe7   :  { %v394_v41 = vpop.f32.mrf.mxu0 }
  0xe8   :  { %v1528_v42 = vmul.f32 -1.442695, %v393_v40  ;;  %v395_v0 = vadd.f32 %v394_v41, %v2442_v52 }
  0xe9   :  { %v396_v43 = vpop.f32.mrf.mxu0 }
  0xea   :  { %1765 = vpow2.f32 %v1528_v42  ;;  %v397_v44 = vadd.f32 %v396_v43, %v2433_v37 }
  0xeb   :  { %v400_v45 = vpop.f32.mrf.mxu0 }
  0xec   :  { %v1529_v46 = vmul.f32 -1.442695, %v397_v44  ;;  %v401_v7 = vadd.f32 %v400_v45, %v2442_v52 }
  0xed   :  { %v402_v48 = vpop.f32.mrf.mxu0 }
  0xee   :  { %1767 = vpow2.f32 %v1529_v46  ;;  %v403_v49 = vadd.f32 %v402_v48, %v2433_v37 }
  0xef   :  { %v404_v50 = vpop.f32.mrf.mxu0 }
  0xf0   :  { %v1530_v51 = vmul.f32 -1.442695, %v403_v49  ;;  %v405_v14 = vadd.f32 %v404_v50, %v2442_v52 }
  0xf1   :  { %v406_v53 = vpop.f32.mrf.mxu0 }
  0xf2   :  { %1769 = vpow2.f32 %v1530_v51  ;;  %v407_v54 = vadd.f32 %v406_v53, %v2433_v37 }
  0xf3   :  { %v410_v55 = vpop.f32.mrf.mxu0 }
  0xf4   :  { %v1531_v56 = vmul.f32 -1.442695, %v407_v54  ;;  %v411_v21 = vadd.f32 %v410_v55, %v2442_v52 }
  0xf5   :  { %v412_v58 = vpop.f32.mrf.mxu0 }
  0xf6   :  { %1771 = vpow2.f32 %v1531_v56  ;;  %v413_v59 = vadd.f32 %v412_v58, %v2433_v37 }
  0xf7   :  { %v1766_v60 = vpop.eup %1765  ;;  %v414_v61 = vpop.f32.mrf.mxu0  ;;  %1773 = vtanh.f32 %v391_v57 }
  0xf8   :  { %v821_v62 = vadd.f32 1.0, %v1766_v60  ;;  %v1532_v63 = vmul.f32 -1.442695, %v413_v59  ;;  %v415_v31 = vadd.f32 %v414_v61, %v2442_v52 }
  0xf9   :  { %v416_v1 = vpop.f32.mrf.mxu0 }
  0xfa   :  { %1775 = vrcp.f32 %v821_v62  ;;  %v417_v2 = vadd.f32 %v416_v1, %v2433_v37 }
  0xfb   :  { %v1768_v3 = vpop.eup %1767  ;;  %1777 = vpow2.f32 %v1532_v63  ;;  %v420_v4 = vpop.f32.mrf.mxu0 }
  0xfc   :  { %v822_v5 = vadd.f32 1.0, %v1768_v3  ;;  %v1533_v6 = vmul.f32 -1.442695, %v417_v2  ;;  %1779 = vtanh.f32 %v395_v0  ;;  %v421_v44 = vadd.f32 %v420_v4, %v2442_v52 }
  0xfd   :  { %v422_v8 = vpop.f32.mrf.mxu0 }
  0xfe   :  { %1781 = vrcp.f32 %v822_v5  ;;  %v423_v9 = vadd.f32 %v422_v8, %v2433_v37 }
  0xff   :  { %v1770_v10 = vpop.eup %1769  ;;  %1783 = vpow2.f32 %v1533_v6  ;;  %v424_v11 = vpop.f32.mrf.mxu0 }
 0x100   :  { %v823_v12 = vadd.f32 1.0, %v1770_v10  ;;  %v1534_v13 = vmul.f32 -1.442695, %v423_v9  ;;  %1785 = vtanh.f32 %v401_v7  ;;  %v425_v56 = vadd.f32 %v424_v11, %v2442_v52 }
 0x101   :  { %v426_v15 = vpop.f32.mrf.mxu0 }
 0x102   :  { %1787 = vrcp.f32 %v823_v12  ;;  %v427_v16 = vadd.f32 %v426_v15, %v2433_v37 }
 0x103   :  { %v1772_v17 = vpop.eup %1771  ;;  %1789 = vpow2.f32 %v1534_v13  ;;  %v430_v18 = vpop.f32.mrf.mxu0 }
 0x104   :  { %v824_v19 = vadd.f32 1.0, %v1772_v17  ;;  %v1535_v20 = vmul.f32 -1.442695, %v427_v16  ;;  %1791 = vtanh.f32 %v405_v14  ;;  %v1774_v23 = vpop.eup %1773  ;;  %v431_v2 = vadd.f32 %v430_v18, %v2442_v52 }
 0x105   :  { %v432_v22 = vpop.f32.mrf.mxu0 }
 0x106   :  { %1793 = vrcp.f32 %v824_v19  ;;  %v433_v24 = vadd.f32 %v432_v22, %v2433_v37 }
 0x107   :  { %v1776_v25 = vpop.eup %1775  ;;  %1795 = vpow2.f32 %v1535_v20  ;;  %v434_v26 = vpop.f32.mrf.mxu0 }
 0x108   :  { %v1778_v27 = vpop.eup %1777  ;;  %v1536_v28 = vmul.f32 -1.442695, %v433_v24  ;;  %v2455_v29 = vmul.f32 %v1776_v25, %v1774_v23  ;;  %1797 = vtanh.f32 %v411_v21  ;;  %v435_v11 = vadd.f32 %v434_v26, %v2442_v52 }
 0x109   :  { %v825_v30 = vadd.f32 1.0, %v1778_v27  ;;  %v436_v32 = vpop.f32.mrf.mxu0  ;;  %v1780_v35 = vpop.eup %1779 }
 0x10a   :  { %1799 = vpow2.f32 %v1536_v28  ;;  %v437_v36 = vadd.f32 %v436_v32, %v2433_v37 }
 0x10b   :  { %v1782_v38 = vpop.eup %1781  ;;  %1801 = vrcp.f32 %v825_v30  ;;  %v440_v39 = vpop.f32.mrf.mxu0 }
 0x10c   :  { %v1784_v40 = vpop.eup %1783  ;;  %v1537_v41 = vmul.f32 -1.442695, %v437_v36  ;;  %v2459_v42 = vmul.f32 %v1782_v38, %v1780_v35  ;;  %1803 = vtanh.f32 %v415_v31  ;;  %v441_v21 = vadd.f32 %v440_v39, %v2442_v52 }
 0x10d   :  { %v826_v43 = vadd.f32 1.0, %v1784_v40  ;;  %v442_v45 = vpop.f32.mrf.mxu0  ;;  %v1786_v46 = vpop.eup %1785 }
 0x10e   :  { %1805 = vpow2.f32 %v1537_v41  ;;  %v443_v48 = vadd.f32 %v442_v45, %v2433_v37 }
 0x10f   :  { %v1788_v49 = vpop.eup %1787  ;;  %1807 = vrcp.f32 %v826_v43  ;;  %v444_v50 = vpop.f32.mrf.mxu0 }
 0x110   :  { %v1790_v51 = vpop.eup %1789  ;;  %v1538_v53 = vmul.f32 -1.442695, %v443_v48  ;;  %v2463_v54 = vmul.f32 %v1788_v49, %v1786_v46  ;;  %1809 = vtanh.f32 %v421_v44  ;;  %v445_v32 = vadd.f32 %v444_v50, %v2442_v52 }
 0x111   :  { %v827_v55 = vadd.f32 1.0, %v1790_v51  ;;  %v446_v57 = vpop.f32.mrf.mxu0  ;;  %v1792_v58 = vpop.eup %1791 }
 0x112   :  { %1811 = vpow2.f32 %v1538_v53  ;;  %v447_v59 = vadd.f32 %v446_v57, %v2433_v37 }
 0x113   :  { %v1794_v60 = vpop.eup %1793  ;;  %1813 = vrcp.f32 %v827_v55  ;;  %v450_v61 = vpop.f32.mrf.mxu0 }
 0x114   :  { %v1796_v62 = vpop.eup %1795  ;;  %v1539_v63 = vmul.f32 -1.442695, %v447_v59  ;;  %v2467_v0 = vmul.f32 %v1794_v60, %v1792_v58  ;;  %1815 = vtanh.f32 %v425_v56  ;;  %v451_v46 = vadd.f32 %v450_v61, %v2442_v52 }
 0x115   :  { %v828_v1 = vadd.f32 1.0, %v1796_v62  ;;  %v452_v3 = vpop.f32.mrf.mxu0  ;;  %v1798_v4 = vpop.eup %1797 }
 0x116   :  { %1817 = vpow2.f32 %v1539_v63  ;;  %v453_v5 = vadd.f32 %v452_v3, %v2433_v37 }
 0x117   :  { %v1800_v6 = vpop.eup %1799  ;;  %1819 = vrcp.f32 %v828_v1  ;;  %v454_v7 = vpop.f32.mrf.mxu0 }
 0x118   :  { %v1802_v8 = vpop.eup %1801  ;;  %v829_v9 = vadd.f32 1.0, %v1800_v6  ;;  %v1540_v10 = vmul.f32 -1.442695, %v453_v5  ;;  %1821 = vtanh.f32 %v431_v2  ;;  %v455_v60 = vadd.f32 %v454_v7, %v2442_v52 }
 0x119   :  { %v456_v12 = vpop.f32.mrf.mxu0  ;;  %v2472_v13 = vmul.f32 %v1802_v8, %v1798_v4  ;;  %v1804_v14 = vpop.eup %1803 }
 0x11a   :  { %1823 = vrcp.f32 %v829_v9  ;;  %v457_v15 = vadd.f32 %v456_v12, %v2433_v37 }
 0x11b   :  { %v1806_v16 = vpop.eup %1805  ;;  %1825 = vpow2.f32 %v1540_v10  ;;  %v460_v17 = vpop.f32.mrf.mxu0 }
 0x11c   :  { %v1808_v18 = vpop.eup %1807  ;;  %v830_v19 = vadd.f32 1.0, %v1806_v16  ;;  %v1541_v20 = vmul.f32 -1.442695, %v457_v15  ;;  %1827 = vtanh.f32 %v435_v11  ;;  %v461_v8 = vadd.f32 %v460_v17, %v2442_v52 }
 0x11d   :  { %v462_v22 = vpop.f32.mrf.mxu0  ;;  %v2476_v23 = vmul.f32 %v1808_v18, %v1804_v14  ;;  %v1810_v24 = vpop.eup %1809 }
 0x11e   :  { %1829 = vrcp.f32 %v830_v19  ;;  %v463_v25 = vadd.f32 %v462_v22, %v2433_v37 }
 0x11f   :  { %v1812_v26 = vpop.eup %1811  ;;  %1831 = vpow2.f32 %v1541_v20  ;;  %v464_v27 = vpop.f32.mrf.mxu0 }
 0x120   :  { %v1814_v28 = vpop.eup %1813  ;;  %v831_v30 = vadd.f32 1.0, %v1812_v26  ;;  %v1542_v31 = vmul.f32 -1.442695, %v463_v25  ;;  %1833 = vtanh.f32 %v441_v21  ;;  %v465_v19 = vadd.f32 %v464_v27, %v2442_v52 }
 0x121   :  { %v466_v35 = vpop.f32.mrf.mxu0  ;;  %v2480_v36 = vmul.f32 %v1814_v28, %v1810_v24  ;;  %v1816_v38 = vpop.eup %1815 }
 0x122   :  { %1835 = vrcp.f32 %v831_v30  ;;  %v467_v39 = vadd.f32 %v466_v35, %v2433_v37 }
 0x123   :  { %v1818_v40 = vpop.eup %1817  ;;  %1837 = vpow2.f32 %v1542_v31  ;;  %v470_v41 = vpop.f32.mrf.mxu0 }
 0x124   :  { %v1820_v43 = vpop.eup %1819  ;;  %v832_v44 = vadd.f32 1.0, %v1818_v40  ;;  %v1543_v45 = vmul.f32 -1.442695, %v467_v39  ;;  %1839 = vtanh.f32 %v445_v32  ;;  %v471_v31 = vadd.f32 %v470_v41, %v2442_v52 }
 0x125   :  { %v472_v48 = vpop.f32.mrf.mxu0  ;;  %v2484_v49 = vmul.f32 %v1820_v43, %v1816_v38  ;;  %v1822_v50 = vpop.eup %1821 }
 0x126   :  { %1841 = vrcp.f32 %v832_v44  ;;  %v473_v51 = vadd.f32 %v472_v48, %v2433_v37 }
 0x127   :  { %v1824_v53 = vpop.eup %1823  ;;  %1843 = vpow2.f32 %v1543_v45  ;;  %v474_v55 = vpop.f32.mrf.mxu0 }
 0x128   :  { %v1826_v56 = vpop.eup %1825  ;;  %v1544_v57 = vmul.f32 -1.442695, %v473_v51  ;;  %v2487_v58 = vmul.f32 %v1824_v53, %v1822_v50  ;;  %1845 = vtanh.f32 %v451_v46  ;;  %v475_v45 = vadd.f32 %v474_v55, %v2442_v52 }
 0x129   :  { %v833_v59 = vadd.f32 1.0, %v1826_v56  ;;  %v476_v62 = vpop.f32.mrf.mxu0  ;;  %v1828_v61 = vpop.eup %1827 }
 0x12a   :  { %1847 = vpow2.f32 %v1544_v57  ;;  %v477_v63 = vadd.f32 %v476_v62, %v2433_v37 }
 0x12b   :  { %v1830_v1 = vpop.eup %1829  ;;  %1849 = vrcp.f32 %v833_v59  ;;  %v480_v2 = vpop.f32.mrf.mxu0 }
 0x12c   :  { %v1832_v3 = vpop.eup %1831  ;;  %v1545_v4 = vmul.f32 -1.442695, %v477_v63  ;;  %v2491_v5 = vmul.f32 %v1830_v1, %v1828_v61  ;;  %1851 = vtanh.f32 %v455_v60  ;;  %v481_v60 = vadd.f32 %v480_v2, %v2442_v52 }
 0x12d   :  { %v834_v6 = vadd.f32 1.0, %v1832_v3  ;;  %v482_v9 = vpop.f32.mrf.mxu0  ;;  %v1834_v10 = vpop.eup %1833 }
 0x12e   :  { %1853 = vpow2.f32 %v1545_v4  ;;  %v483_v7 = vadd.f32 %v482_v9, %v2433_v37 }
 0x12f   :  { %v1836_v11 = vpop.eup %1835  ;;  %1855 = vrcp.f32 %v834_v6  ;;  %v484_v12 = vpop.f32.mrf.mxu0 }
 0x130   :  { %v1838_v14 = vpop.eup %1837  ;;  %v1546_v15 = vmul.f32 -1.442695, %v483_v7  ;;  %v2495_v16 = vmul.f32 %v1836_v11, %v1834_v10  ;;  %1857 = vtanh.f32 %v461_v8  ;;  %v485_v9 = vadd.f32 %v484_v12, %v2442_v52 }
 0x131   :  { %v835_v18 = vadd.f32 1.0, %v1838_v14  ;;  %v486_v20 = vpop.f32.mrf.mxu0  ;;  %v1840_v21 = vpop.eup %1839 }
 0x132   :  { %1859 = vpow2.f32 %v1546_v15  ;;  %v487_v17 = vadd.f32 %v486_v20, %v2433_v37 }
 0x133   :  { %v1842_v22 = vpop.eup %1841  ;;  %1861 = vrcp.f32 %v835_v18  ;;  %v490_v24 = vpop.f32.mrf.mxu0 }
 0x134   :  { %v1844_v25 = vpop.eup %1843  ;;  %v1547_v26 = vmul.f32 -1.442695, %v487_v17  ;;  %v2499_v28 = vmul.f32 %v1842_v22, %v1840_v21  ;;  %1863 = vtanh.f32 %v465_v19  ;;  %v2521_v19 = vld [vmem:[%s2860_s3] sm:$0x1]  ;;  %v491_v17 = vadd.f32 %v490_v24, %v2442_v52 }
 0x135   :  { %v836_v30 = vadd.f32 1.0, %v1844_v25  ;;  %v492_v32 = vpop.f32.mrf.mxu0  ;;  %v1846_v35 = vpop.eup %1845  ;;  %1611 = vmatprep.mubr.f32.mxu1 %v2521_v19 }
 0x136   :  { %1865 = vpow2.f32 %v1547_v26  ;;  %v493_v27 = vadd.f32 %v492_v32, %v2433_v37 }
 0x137   :  { %v1848_v38 = vpop.eup %1847  ;;  %1867 = vrcp.f32 %v836_v30  ;;  %v494_v39 = vpop.f32.mrf.mxu0 }
 0x138   :  { %v1850_v40 = vpop.eup %1849  ;;  %v837_v43 = vadd.f32 1.0, %v1848_v38  ;;  %v1548_v44 = vmul.f32 -1.442695, %v493_v27  ;;  %1869 = vtanh.f32 %v471_v31  ;;  %v495_v27 = vadd.f32 %v494_v39, %v2442_v52 }
 0x139   :  { %v496_v46 = vpop.f32.mrf.mxu0  ;;  %v2504_v48 = vmul.f32 %v1850_v40, %v1846_v35  ;;  %v1852_v50 = vpop.eup %1851 }
 0x13a   :  { %1871 = vrcp.f32 %v837_v43  ;;  %v497_v41 = vadd.f32 %v496_v46, %v2433_v37 }
 0x13b   :  { %v1854_v51 = vpop.eup %1853  ;;  %1873 = vpow2.f32 %v1548_v44  ;;  %v500_v53 = vpop.f32.mrf.mxu0 }
 0x13c   :  { %v1856_v56 = vpop.eup %1855  ;;  %v838_v57 = vadd.f32 1.0, %v1854_v51  ;;  %v1549_v59 = vmul.f32 -1.442695, %v497_v41  ;;  %1875 = vtanh.f32 %v475_v45 }
 0x13d   :  { %v502_v62 = vpop.f32.mrf.mxu0  ;;  %v2508_v61 = vmul.f32 %v1856_v56, %v1852_v50  ;;  %v1858_v55 = vpop.eup %1857  ;;  %v501_v50 = vadd.f32 %v500_v53, %v2442_v52 }
 0x13e   :  { %1877 = vrcp.f32 %v838_v57  ;;  %v503_v63 = vadd.f32 %v502_v62, %v2433_v37 }
 0x13f   :  { %v1860_v1 = vpop.eup %1859  ;;  %1879 = vpow2.f32 %v1549_v59  ;;  %v2511_v3 = vpop.f32.mrf.mxu0 }
 0x140   :  { %v1862_v4 = vpop.eup %1861  ;;  %v839_v6 = vadd.f32 1.0, %v1860_v1  ;;  %v1550_v8 = vmul.f32 -1.442695, %v503_v63  ;;  %1881 = vtanh.f32 %v481_v60 }
 0x141   :  { %v506_v10 = vpop.f32.mrf.mxu0  ;;  %v2514_v7 = vmul.f32 %v1862_v4, %v1858_v55  ;;  %v1864_v2 = vpop.eup %1863 }
 0x142   :  { %1883 = vrcp.f32 %v839_v6 }
 0x143   :  { %v1866_v11 = vpop.eup %1865  ;;  %1885 = vpow2.f32 %v1550_v8  ;;  %v2516_v14 = vpop.f32.mrf.mxu0 }
 0x144   :  { %v1868_v15 = vpop.eup %1867  ;;  %v840_v18 = vadd.f32 1.0, %v1866_v11  ;;  %1887 = vtanh.f32 %v485_v9 }
 0x145   :  { %v512_v20 = vpop.f32.mrf.mxu0  ;;  %v2523_v21 = vmul.f32 %v1868_v15, %v1864_v2  ;;  %v1870_v12 = vpop.eup %1869 }
 0x146   :  { %1889 = vrcp.f32 %v840_v18 }
 0x147   :  { %v1872_v22 = vpop.eup %1871  ;;  %v2527_v25 = vpop.f32.mrf.mxu0  ;;  %1891 = vtanh.f32 %v491_v17 }
 0x148   :  { %v1874_v26 = vpop.eup %1873  ;;  %v2529_v30 = vmul.f32 %v1872_v22, %v1870_v12  ;;  %v507_v22 = vadd.f32 %v506_v10, %v2433_v37 }
 0x149   :  { %v841_v31 = vadd.f32 1.0, %v1874_v26  ;;  %v516_v32 = vpop.f32.mrf.mxu0  ;;  %v1876_v35 = vpop.eup %1875 }
 0x14b   :  { %v1878_v38 = vpop.eup %1877  ;;  %1893 = vrcp.f32 %v841_v31  ;;  %v2532_v40 = vpop.f32.mrf.mxu0 }
 0x14c   :  { %v1880_v43 = vpop.eup %1879  ;;  %v2534_v44 = vmul.f32 %v1878_v38, %v1876_v35  ;;  %1895 = vtanh.f32 %v495_v27 }
 0x14d   :  { %v842_v24 = vadd.f32 1.0, %v1880_v43  ;;  %v522_v45 = vpop.f32.mrf.mxu0  ;;  %v1882_v46 = vpop.eup %1881 }
 0x14f   :  { %v1884_v41 = vpop.eup %1883  ;;  %1897 = vrcp.f32 %v842_v24  ;;  %v524_v51 = vpop.f32.mrf.mxu0  ;;  %v513_v24 = vadd.f32 %v512_v20, %v2433_v37 }
 0x150   :  { %v1886_v56 = vpop.eup %1885  ;;  %v2537_v57 = vmul.f32 %v1884_v41, %v1882_v46  ;;  %1899 = vtanh.f32 %v501_v50 }
 0x151   :  { %v843_v39 = vadd.f32 1.0, %v1886_v56  ;;  %v526_v59 = vpop.f32.mrf.mxu0  ;;  %v1888_v60 = vpop.eup %1887  ;;  %v1551_v56 = vmul.f32 -1.442695, %v507_v22 }
 0x153   :  { %v1890_v62 = vpop.eup %1889  ;;  %1901 = vrcp.f32 %v843_v39  ;;  %v530_v55 = vpop.f32.mrf.mxu0 }
 0x154   :  { %v2539_v63 = vmul.f32 %v1890_v62, %v1888_v60  ;;  %v1892_v4 = vpop.eup %1891  ;;  %v517_v60 = vadd.f32 %v516_v32, %v2433_v37  ;;  %v527_v62 = vadd.f32 %v526_v59, %v2433_v37 }
 0x155   :  { %v532_v1 = vpop.f32.mrf.mxu0 }
 0x156   :  { %v533_v38 = vadd.f32 %v532_v1, %v2433_v37  ;;  %v523_v1 = vadd.f32 %v522_v45, %v2433_v37  ;;  %v525_v45 = vadd.f32 %v524_v51, %v2442_v52 }
 0x157   :  { %v534_v6 = vpop.f32.mrf.mxu0 }
 0x158   :  { %v1894_v8 = vpop.eup %1893  ;;  %v1554_v22 = vmul.f32 -1.442695, %v523_v1 }
 0x159   :  { %v536_v53 = vpop.f32.mrf.mxu0  ;;  %v2541_v9 = vmul.f32 %v1894_v8, %v1892_v4  ;;  %v1896_v2 = vpop.eup %1895  ;;  %v1556_v4 = vmul.f32 -1.442695, %v533_v38 }
 0x15a   :  { %v537_v18 = vadd.f32 %v536_v53, %v2433_v37  ;;  %v1552_v53 = vmul.f32 -1.442695, %v513_v24 }
 0x15b   :  { %v540_v11 = vpop.f32.mrf.mxu0 }
 0x15c   :  { %v1898_v15 = vpop.eup %1897  ;;  %v1557_v46 = vmul.f32 -1.442695, %v537_v18 }
 0x15d   :  { %v542_v12 = vpop.f32.mrf.mxu0  ;;  %v2544_v17 = vmul.f32 %v1898_v15, %v1896_v2  ;;  %v1900_v31 = vpop.eup %1899  ;;  %v1553_v15 = vmul.f32 -1.442695, %v517_v60 }
 0x15e   :  { %v543_v26 = vadd.f32 %v542_v12, %v2433_v37  ;;  %v1555_v12 = vmul.f32 -1.442695, %v527_v62 }
 0x15f   :  { %v544_v35 = vpop.f32.mrf.mxu0 }
 0x160   :  { %v1902_v27 = vpop.eup %1901  ;;  %v1558_v43 = vmul.f32 -1.442695, %v543_v26  ;;  %v545_v51 = vadd.f32 %v544_v35, %v2442_v52 }
 0x161   :  { %v546_v50 = vpop.f32.mrf.mxu0  ;;  %v2550_v41 = vmul.f32 %v1902_v27, %v1900_v31  ;;  %v531_v27 = vadd.f32 %v530_v55, %v2442_v52 }
 0x162   :  { %v547_v39 = vadd.f32 %v546_v50, %v2433_v37  ;;  %1903 = vpow2.f32 %v1558_v43  ;;  %v535_v43 = vadd.f32 %v534_v6, %v2442_v52  ;;  %v541_v50 = vadd.f32 %v540_v11, %v2442_v52 }
 0x163   :  { %v550_v10 = vpop.f32.mrf.mxu0  ;;  %1905 = vpow2.f32 %v1557_v46 }
 0x164   :  { %v1559_v8 = vmul.f32 -1.442695, %v547_v39  ;;  %1907 = vpow2.f32 %v1551_v56  ;;  %v551_v1 = vadd.f32 %v550_v10, %v2442_v52 }
 0x165   :  { %v552_v20 = vpop.f32.mrf.mxu0 }
 0x166   :  { %v553_v2 = vadd.f32 %v552_v20, %v2433_v37  ;;  %1909 = vpow2.f32 %v1559_v8 }
 0x167   :  { %v554_v18 = vpop.f32.mrf.mxu0  ;;  %1911 = vpow2.f32 %v1556_v4 }
 0x168   :  { %v1560_v32 = vmul.f32 -1.442695, %v553_v2  ;;  %1913 = vpow2.f32 %v1552_v53 }
 0x169   :  { %v556_v26 = vpop.f32.mrf.mxu0 }
 0x16a   :  { %1915 = vpow2.f32 %v1560_v32  ;;  %v557_v59 = vadd.f32 %v556_v26, %v2433_v37 }
 0x16b   :  { %1917 = vpow2.f32 %v1553_v15  ;;  %v560_v31 = vpop.f32.mrf.mxu0 }
 0x16c   :  { %1919 = vpow2.f32 %v1555_v12  ;;  %v1561_v38 = vmul.f32 -1.442695, %v557_v59 }
 0x16d   :  { %1921 = vpow2.f32 %v1554_v22  ;;  %v562_v24 = vpop.f32.mrf.mxu0 }
 0x16e   :  { %1923 = vpow2.f32 %v1561_v38  ;;  %v563_v46 = vadd.f32 %v562_v24, %v2433_v37  ;;  %v555_v24 = vadd.f32 %v554_v18, %v2442_v52  ;;  %v561_v18 = vadd.f32 %v560_v31, %v2442_v52 }
 0x16f   :  { %1925 = vtanh.f32 %v525_v45  ;;  %v2563_v56 = vpop.f32.mrf.mxu0  ;;  %v1904_v39 = vpop.eup %1903 }
 0x170   :  { %1927 = vtanh.f32 %v531_v27  ;;  %v1562_v60 = vmul.f32 -1.442695, %v563_v46  ;;  %v851_v55 = vadd.f32 1.0, %v1904_v39  ;;  %v1906_v4 = vpop.eup %1905 }
 0x171   :  { %1929 = vtanh.f32 %v535_v43  ;;  %v566_v62 = vpop.f32.mrf.mxu0  ;;  %v2567_v8 = vpop.eup %1907  ;;  %v850_v35 = vadd.f32 1.0, %v1906_v4 }
 0x172   :  { %1931 = vpow2.f32 %v1562_v60  ;;  %v567_v6 = vadd.f32 %v566_v62, %v2433_v37 }
 0x173   :  { %1933 = vtanh.f32 %v541_v50  ;;  %v2569_v53 = vpop.f32.mrf.mxu0  ;;  %v1910_v11 = vpop.eup %1909 }
 0x174   :  { %1935 = vtanh.f32 %v545_v51  ;;  %v1563_v20 = vmul.f32 -1.442695, %v567_v6  ;;  %v1912_v2 = vpop.eup %1911  ;;  %v852_v15 = vadd.f32 1.0, %v1910_v11 }
 0x175   :  { %1937 = vrcp.f32 %v851_v55  ;;  %v572_v12 = vpop.f32.mrf.mxu0  ;;  %v2572_v32 = vpop.eup %1913  ;;  %v849_v27 = vadd.f32 1.0, %v1912_v2 }
 0x176   :  { %1939 = vpow2.f32 %v1563_v20  ;;  %v573_v22 = vadd.f32 %v572_v12, %v2433_v37 }
 0x177   :  { %v1916_v26 = vpop.eup %1915  ;;  %1941 = vrcp.f32 %v852_v15  ;;  %v2575_v59 = vpop.f32.mrf.mxu0 }
 0x178   :  { %v1918_v45 = vpop.eup %1917  ;;  %1943 = vtanh.f32 %v551_v1  ;;  %v853_v38 = vadd.f32 1.0, %v1916_v26  ;;  %v1564_v10 = vmul.f32 -1.442695, %v573_v22 }
 0x179   :  { %v1920_v43 = vpop.eup %1919  ;;  %1945 = vrcp.f32 %v850_v35  ;;  %v576_v46 = vpop.f32.mrf.mxu0 }
 0x17a   :  { %v1922_v50 = vpop.eup %1921  ;;  %1947 = vrcp.f32 %v853_v38  ;;  %v577_v39 = vadd.f32 %v576_v46, %v2433_v37  ;;  %v848_v62 = vadd.f32 1.0, %v1920_v43 }
 0x17b   :  { %v1924_v51 = vpop.eup %1923  ;;  %1949 = vpow2.f32 %v1564_v10  ;;  %v2579_v60 = vpop.f32.mrf.mxu0  ;;  %v847_v22 = vadd.f32 1.0, %v1922_v50  ;;  %v565_v10 = vadd.f32 %v2563_v56, %v2442_v52  ;;  %v521_v50 = vadd.f32 %v2532_v40, %v2442_v52 }
 0x17c   :  { %v2581_v55 = vpop.eup %1925  ;;  %1951 = vrcp.f32 %v849_v27  ;;  %v854_v4 = vadd.f32 1.0, %v1924_v51  ;;  %v1565_v6 = vmul.f32 -1.442695, %v577_v39 }
 0x17d   :  { %v2583_v11 = vpop.eup %1927  ;;  %1953 = vtanh.f32 %v555_v24  ;;  %v582_v1 = vpop.f32.mrf.mxu0 }
 0x17e   :  { %v1930_v20 = vpop.eup %1929  ;;  %1955 = vrcp.f32 %v854_v4  ;;  %v583_v2 = vadd.f32 %v582_v1, %v2433_v37 }
 0x17f   :  { %v1932_v35 = vpop.eup %1931  ;;  %1957 = vpow2.f32 %v1565_v6  ;;  %v2587_v15 = vpop.f32.mrf.mxu0 }
 0x180   :  { %v1934_v12 = vpop.eup %1933  ;;  %1959 = vrcp.f32 %v848_v62  ;;  %v855_v26 = vadd.f32 1.0, %v1932_v35  ;;  %v1566_v27 = vmul.f32 -1.442695, %v583_v2  ;;  %v571_v35 = vadd.f32 %v2569_v53, %v2442_v52 }
 0x181   :  { %v1936_v38 = vpop.eup %1935  ;;  %1961 = vtanh.f32 %v561_v18  ;;  %v586_v31 = vpop.f32.mrf.mxu0  ;;  %v846_v18 = vadd.f32 1.0, %v1918_v45 }
 0x182   :  { %v1938_v43 = vpop.eup %1937  ;;  %1963 = vrcp.f32 %v855_v26  ;;  %v587_v24 = vadd.f32 %v586_v31, %v2433_v37  ;;  %v515_v31 = vadd.f32 %v2527_v25, %v2442_v52 }
 0x183   :  { %v1940_v46 = vpop.eup %1939  ;;  %1965 = vpow2.f32 %v1566_v27  ;;  %v2592_v39 = vpop.f32.mrf.mxu0  ;;  %v995_v40 = vmul.f32 %v1938_v43, %v1934_v12  ;;  %v575_v12 = vadd.f32 %v2575_v59, %v2442_v52 }
 0x184   :  { %v1942_v51 = vpop.eup %1941  ;;  %1967 = vrcp.f32 %v847_v22  ;;  %v856_v62 = vadd.f32 1.0, %v1940_v46  ;;  %v1567_v4 = vmul.f32 -1.442695, %v587_v24 }
 0x185   :  { %v1944_v6 = vpop.eup %1943  ;;  %1969 = vtanh.f32 %v565_v10  ;;  %v2596_v56 = vpop.f32.mrf.mxu0  ;;  %v996_v1 = vmul.f32 %v1942_v51, %v1936_v38  ;;  %v845_v10 = vadd.f32 1.0, %v2572_v32 }
 0x186   :  { %v1946_v2 = vpop.eup %1945  ;;  %1971 = vrcp.f32 %v856_v62 }
 0x187   :  { %v1948_v26 = vpop.eup %1947  ;;  %1973 = vpow2.f32 %v1567_v4  ;;  %1579 = vmatprep.subr.mxu1 %v996_v1  ;;  %v2600_v27 = vpop.f32.mrf.mxu0  ;;  %v844_v4 = vadd.f32 1.0, %v2567_v8 }
 0x188   :  { %v1950_v22 = vpop.eup %1949  ;;  %1975 = vtanh.f32 %v521_v50  ;;  %1580 = vmatpush3.xpose.msra.mxu1 %v2523_v21  ;;  %v2605_v45 = vmul.f32 %v1948_v26, %v1944_v6  ;;  %v994_v21 = vmul.f32 %v1946_v2, %v1930_v20  ;;  %v511_v50 = vadd.f32 %v2516_v14, %v2442_v52 }
 0x189   :  { %v1952_v38 = vpop.eup %1951  ;;  %1977 = vrcp.f32 %v846_v18  ;;  %v857_v53 = vadd.f32 1.0, %v1950_v22  ;;  %1581 = vmatprep.subr.mxu1 %v995_v40  ;;  %v2608_v24 = vpop.f32.mrf.mxu0  ;;  %v581_v20 = vadd.f32 %v2579_v60, %v2442_v52  ;;  %v505_v26 = vadd.f32 %v2511_v3, %v2442_v52 }
 0x18a   :  { %v1954_v46 = vpop.eup %1953  ;;  %1979 = vtanh.f32 %v571_v35 }
 0x18b   :  { %v1956_v43 = vpop.eup %1955  ;;  %1981 = vrcp.f32 %v857_v53  ;;  %v2612_v25 = vpop.f32.mrf.mxu0 }
 0x18c   :  { %v1958_v51 = vpop.eup %1957  ;;  %1983 = vtanh.f32 %v515_v31  ;;  %1582 = vmatpush3.xpose.msra.mxu1 %v2514_v7  ;;  %v2617_v32 = vmul.f32 %v1956_v43, %v1954_v46  ;;  %v993_v7 = vmul.f32 %v1952_v38, %v2583_v11  ;;  %v585_v11 = vadd.f32 %v2587_v15, %v2442_v52 }
 0x18d   :  { %v1960_v62 = vpop.eup %1959  ;;  %1985 = vrcp.f32 %v845_v10  ;;  %v858_v6 = vadd.f32 1.0, %v1958_v51  ;;  %1583 = vmatprep.subr.mxu1 %v994_v21  ;;  %v2620_v59 = vpop.f32.mrf.mxu0 }
 0x18e   :  { %v1962_v18 = vpop.eup %1961  ;;  %1987 = vtanh.f32 %v575_v12 }
 0x18f   :  { %v1964_v1 = vpop.eup %1963  ;;  %1989 = vrcp.f32 %v858_v6  ;;  %v2624_v14 = vpop.f32.mrf.mxu0 }
 0x190   :  { %v1966_v2 = vpop.eup %1965  ;;  %1991 = vtanh.f32 %v511_v50  ;;  %1584 = vmatpush3.xpose.msra.mxu1 %v2508_v61  ;;  %v2628_v8 = vmul.f32 %v1964_v1, %v1962_v18  ;;  %v992_v61 = vmul.f32 %v1960_v62, %v2581_v55 }
 0x191   :  { %v1968_v35 = vpop.eup %1967  ;;  %1993 = vrcp.f32 %v844_v4  ;;  %v859_v40 = vadd.f32 1.0, %v1966_v2  ;;  %1585 = vmatprep.subr.mxu1 %v993_v7  ;;  %v2632_v60 = vpop.f32.mrf.mxu0 }
 0x192   :  { %v1970_v22 = vpop.eup %1969  ;;  %1995 = vtanh.f32 %v581_v20 }
 0x193   :  { %v1972_v31 = vpop.eup %1971  ;;  %1997 = vrcp.f32 %v859_v40  ;;  %v2636_v38 = vpop.f32.mrf.mxu0 }
 0x194   :  { %v1974_v10 = vpop.eup %1973  ;;  %1586 = vmatpush3.xpose.msra.mxu1 %v2504_v48  ;;  %v2640_v3 = vmul.f32 %v1972_v31, %v1970_v22  ;;  %1999 = vtanh.f32 %v505_v26 }
 0x195   :  { %v1976_v53 = vpop.eup %1975  ;;  %v860_v46 = vadd.f32 1.0, %v1974_v10  ;;  %1587 = vmatprep.subr.mxu1 %v992_v61  ;;  %v612_v12 = vpop.f32.mrf.mxu0  ;;  %2001 = vtanh.f32 %v585_v11 }
 0x196   :  { %v1978_v43 = vpop.eup %1977  ;;  %v991_v51 = vmul.f32 %v1976_v53, %v1968_v35 }
 0x197   :  { %v1980_v21 = vpop.eup %1979  ;;  %2003 = vrcp.f32 %v860_v46  ;;  %v2642_v15 = vpop.f32.mrf.mxu0 }
 0x198   :  { %v1982_v50 = vpop.eup %1981  ;;  %1588 = vmatpush3.xpose.msra.mxu1 %v2499_v28 }
 0x199   :  { %v1984_v55 = vpop.eup %1983  ;;  %1589 = vmatprep.subr.mxu1 %v991_v51  ;;  %v616_v48 = vpop.f32.mrf.mxu0  ;;  %v2645_v62 = vmul.f32 %v1982_v50, %v1980_v21 }
 0x19a   :  { %v1986_v4 = vpop.eup %1985  ;;  %v990_v20 = vmul.f32 %v1984_v55, %v1978_v43 }
 0x19b   :  { %v1988_v6 = vpop.eup %1987  ;;  %v620_v18 = vpop.f32.mrf.mxu0 }
 0x19c   :  { %v1990_v1 = vpop.eup %1989  ;;  %1590 = vmatpush3.xpose.msra.mxu1 %v2495_v16  ;;  %v617_v16 = vadd.f32 %v616_v48, %v2433_v37  ;;  %v607_v48 = vadd.f32 %v2632_v60, %v2433_v37 }
 0x19d   :  { %v1992_v7 = vpop.eup %1991  ;;  %1591 = vmatprep.subr.mxu1 %v990_v20  ;;  %v622_v2 = vpop.f32.mrf.mxu0  ;;  %v2648_v26 = vmul.f32 %v1990_v1, %v1988_v6 }
 0x19e   :  { %v1994_v35 = vpop.eup %1993  ;;  %v623_v28 = vadd.f32 %v622_v2, %v2433_v37  ;;  %v989_v11 = vmul.f32 %v1992_v7, %v1986_v4  ;;  %v1573_v6 = vmul.f32 -1.442695, %v617_v16 }
 0x19f   :  { %v1996_v40 = vpop.eup %1995  ;;  %v624_v22 = vpop.f32.mrf.mxu0 }
 0x1a0   :  { %v1998_v31 = vpop.eup %1997  ;;  %1592 = vmatpush3.xpose.msra.mxu1 %v2491_v5  ;;  %v1574_v46 = vmul.f32 -1.442695, %v623_v28  ;;  %v613_v5 = vadd.f32 %v612_v12, %v2433_v37  ;;  %v1571_v12 = vmul.f32 -1.442695, %v607_v48  ;;  %v625_v60 = vadd.f32 %v624_v22, %v2442_v52 }
 0x1a1   :  { %1593 = vmatprep.subr.mxu1 %v989_v11  ;;  %v626_v61 = vpop.f32.mrf.mxu0  ;;  %v2652_v10 = vmul.f32 %v1998_v31, %v1996_v40  ;;  %v2000_v53 = vpop.eup %1999 }
 0x1a2   :  { %v627_v43 = vadd.f32 %v626_v61, %v2433_v37  ;;  %v2002_v21 = vpop.eup %2001  ;;  %v988_v51 = vmul.f32 %v2000_v53, %v1994_v35  ;;  %2005 = vpow2.f32 %v1574_v46  ;;  %v1572_v20 = vmul.f32 -1.442695, %v613_v5 }
 0x1a3   :  { %v595_v53 = vadd.f32 %v2600_v27, %v2442_v52 }
 0x1a4   :  { %v2004_v50 = vpop.eup %2003  ;;  %v1575_v55 = vmul.f32 -1.442695, %v627_v43  ;;  %1594 = vmatpush3.xpose.msra.mxu1 %v2487_v58  ;;  %v603_v58 = vadd.f32 %v2620_v59, %v2433_v37 }
 0x1a5   :  { %1595 = vmatprep.subr.mxu1 %v988_v51  ;;  %v2657_v4 = vmul.f32 %v2004_v50, %v2002_v21  ;;  %v591_v21 = vadd.f32 %v2592_v39, %v2442_v52 }
 0x1a6   :  { %2007 = vpow2.f32 %v1575_v55 }
 0x1a7   :  { %2009 = vpow2.f32 %v1573_v6 }
 0x1a8   :  { %1596 = vmatpush3.xpose.msra.mxu1 %v2484_v49  ;;  %2011 = vpow2.f32 %v1572_v20  ;;  %v597_v49 = vadd.f32 %v2608_v24, %v2433_v37 }
 0x1a9   :  { %1597 = vmatprep.subr.mxu1 %v2550_v41  ;;  %v1570_v41 = vmul.f32 -1.442695, %v603_v58  ;;  %2013 = vpow2.f32 %v1571_v12 }
 0x1aa   :  { %v1569_v59 = vmul.f32 -1.442695, %v597_v49 }
 0x1ab   :  { %2015 = vpow2.f32 %v1570_v41 }
 0x1ac   :  { %1598 = vmatpush3.xpose.msra.mxu1 %v2480_v36  ;;  %2017 = vtanh.f32 %v625_v60  ;;  %v2076_v60 = vld [vmem:[%s2857_s0 + $0x18] sm:$0xff]  }
 0x1ad   :  { %1599 = vmatprep.subr.mxu1 %v2544_v17  ;;  %v593_v17 = vadd.f32 %v2596_v56, %v2433_v37  ;;  %v615_v56 = vadd.f32 %v2642_v15, %v2442_v52 }
 0x1af   :  { %v2006_v1 = vpop.eup %2005  ;;  %v1568_v2 = vmul.f32 -1.442695, %v593_v17  ;;  %v2079_v17 = vld [vmem:[%s2857_s0 + $0x48] sm:$0xff]  }
 0x1b0   :  { %1600 = vmatpush3.xpose.msra.mxu1 %v2476_v23  ;;  %v867_v23 = vadd.f32 1.0, %v2006_v1  ;;  %v2077_v1 = vld [vmem:[%s2857_s0 + $0x50] sm:$0xff]  }
 0x1b1   :  { %1601 = vmatprep.subr.mxu1 %v2541_v9  ;;  %v621_v9 = vadd.f32 %v620_v18, %v2442_v52 }
 0x1b3   :  { %v2008_v36 = vpop.eup %2007 }
 0x1b4   :  { %1602 = vmatpush3.xpose.msra.mxu1 %v2472_v13  ;;  %v868_v7 = vadd.f32 1.0, %v2008_v36  ;;  %v2010_v24 = vpop.eup %2009  ;;  %v2078_v36 = vld [vmem:[%s2857_s0 + $0x10] sm:$0xff]  }
 0x1b5   :  { %1603 = vmatprep.subr.mxu1 %v2539_v63  ;;  %v866_v13 = vadd.f32 1.0, %v2010_v24  ;;  %v2012_v37 = vpop.eup %2011 }
 0x1b6   :  { %2019 = vrcp.f32 %v868_v7  ;;  %v865_v63 = vadd.f32 1.0, %v2012_v37  ;;  %v2014_v18 = vpop.eup %2013  ;;  %v2081_v7 = vld [vmem:[%s2857_s0 + $0x40] sm:$0xff]   ;;  %v1014_v37 = vstv %s102_s25 }
 0x1b7   :  { %2021 = vpow2.f32 %v1569_v59  ;;  %v864_v35 = vadd.f32 1.0, %v2014_v18  ;;  %v2080_v59 = vld [vmem:[%s2857_s0 + $0x8] sm:$0xff]  }
 0x1b8   :  { %1604 = vmatpush3.xpose.msra.mxu1 %v2467_v0  ;;  %2023 = vrcp.f32 %v867_v23  ;;  %v611_v0 = vadd.f32 %v2636_v38, %v2442_v52  ;;  %v2082_v23 = vld [vmem:[%s2857_s0] sm:$0xff]  }
 0x1b9   :  { %1605 = vmatprep.subr.mxu1 %v2537_v57  ;;  %2025 = vtanh.f32 %v621_v9  ;;  %v2016_v57 = vpop.eup %2015  ;;  %v2215_v9 = vmov 1966171168  }
 0x1ba   :  { %2027 = vpow2.f32 %v1568_v2  ;;  %v2018_v15 = vpop.eup %2017  ;;  %v863_v22 = vadd.f32 1.0, %v2016_v57  ;;  %v1176_v2 = vunpack.c.l.s4 %v2215_v9 }
 0x1bb   :  { %2029 = vrcp.f32 %v866_v13  ;;  %v1158_v13 = vand.u32 127, %v113_v33 }
 0x1bc   :  { %1606 = vmatpush3.xpose.msra.mxu1 %v2463_v54  ;;  %2031 = vtanh.f32 %v615_v56  ;;  %v605_v54 = vadd.f32 %v2624_v14, %v2442_v52 }
 0x1bd   :  { %1607 = vmatprep.subr.mxu1 %v2534_v44  ;;  %2033 = vrcp.f32 %v865_v63  ;;  %v2213_v44 = vmov 0.0   ;;  %v1177_v63 = vunpack.c.0.s8 %v1176_v2  ;;  %v1160_v57 = vadd.s32 256, %v1158_v13 }
 0x1be   :  { %2035 = vtanh.f32 %v611_v0  ;;  %51 = vst.msk [vmem:[#allocation12] sm:$0x1] %vm49_vm5, %v2213_v44 }
 0x1bf   :  { %2037 = vrcp.f32 %v864_v35  ;;  %v1180_v35 = vsub.s32 %v1177_v63, %v2427_v34  ;;  %vm1167_vm3 = vcmp.lt.s32.totalorder %v1160_v57, 300  ;;  %53 = vst.msk [vmem:[#allocation2] sm:$0x1] %vm52_vm6, %v2213_v44 }
 0x1c0   :  { %1608 = vmatpush3.xpose.msra.mxu1 %v2459_v42  ;;  %2039 = vtanh.f32 %v605_v54 }
 0x1c1   :  { %1609 = vmatprep.subr.mxu1 %v2529_v30  ;;  %v601_v30 = vadd.f32 %v2612_v25, %v2442_v52  ;;  %2041 = vrcp.f32 %v863_v22 }
 0x1c3   :  { %v2020_v28 = vpop.eup %2019  ;;  %2043 = vtanh.f32 %v601_v30 }
 0x1c4   :  { %1610 = vmatpush3.xpose.msra.mxu1 %v2455_v29  ;;  %v1012_v38 = vmul.f32 %v2020_v28, %v2018_v15  ;;  %v2022_v40 = vpop.eup %2021 }
 0x1c5   :  { %1661 = vmatprep.subr.mxu1 %v2213_v44  ;;  %v2024_v42 = vpop.eup %2023  ;;  %v862_v11 = vadd.f32 1.0, %v2022_v40 }
 0x1c6   :  { %v2026_v29 = vpop.eup %2025 }
 0x1c7   :  { %1612 = vmatmul.mubr.f32.vlgmr.msra.gmra.mxu1 %v2521_v19  ;;  %v2028_v14 = vpop.eup %2027  ;;  %v1011_v31 = vmul.f32 %v2026_v29, %v2024_v42  ;;  %2045 = vrcp.f32 %v862_v11 }
 0x1c8   :  { %1662 = vmatpush3.xpose.msra.mxu1 %v1012_v38  ;;  %1693 = vmatprep.mubr.msk.f32.mxu1 %vm2214_vm1, %v2213_v44  ;;  %v2030_v61 = vpop.eup %2029  ;;  %v861_v16 = vadd.f32 1.0, %v2028_v14  ;;  %2047 = vtanh.f32 %v595_v53  ;;  %v2216_v53 = vmov -1e+30  }
 0x1c9   :  { %1663 = vmatprep.subr.mxu1 %v2213_v44  ;;  %v2032_v25 = vpop.eup %2031  ;;  %50 = vst.msk [vmem:[#allocation10] sm:$0x1] %vm49_vm5, %v2216_v53 }
 0x1ca   :  { %v1010_v46 = vmul.f32 %v2032_v25, %v2030_v61  ;;  %v2034_v43 = vpop.eup %2033  ;;  %2049 = vrcp.f32 %v861_v16 }
 0x1cb   :  { %v2036_v51 = vpop.eup %2035  ;;  %2051 = vtanh.f32 %v591_v21 }
 0x1cc   :  { %1664 = vmatpush3.xpose.msra.mxu1 %v1011_v31  ;;  %v1009_v50 = vmul.f32 %v2036_v51, %v2034_v43  ;;  %v2038_v27 = vpop.eup %2037 }
 0x1cd   :  { %1665 = vmatprep.subr.mxu1 %v2213_v44  ;;  %v2040_v55 = vpop.eup %2039 }
 0x1ce   :  { %v1008_v5 = vmul.f32 %v2040_v55, %v2038_v27  ;;  %v2042_v6 = vpop.eup %2041 }
 0x1d0   :  { %1666 = vmatpush3.xpose.msra.mxu1 %v1010_v46  ;;  %v2044_v48 = vpop.eup %2043  ;;  %v1203_v25 = vld [vmem:[#allocation10] sm:$0x1] }
 0x1d1   :  { %1667 = vmatprep.subr.mxu1 %v2213_v44  ;;  %v1007_v52 = vmul.f32 %v2044_v48, %v2042_v6 }
 0x1d4   :  { %1668 = vmatpush3.xpose.msra.mxu1 %v1009_v50  ;;  %v2046_v39 = vpop.eup %2045 }
 0x1d5   :  { %1669 = vmatprep.subr.mxu1 %v2213_v44  ;;  %v2048_v20 = vpop.eup %2047 }
 0x1d6   :  { %v1006_v58 = vmul.f32 %v2048_v20, %v2046_v39 }
 0x1d7   :  { %v2050_v12 = vpop.eup %2049 }
 0x1d8   :  { %1670 = vmatpush3.xpose.msra.mxu1 %v1008_v5  ;;  %v2052_v49 = vpop.eup %2051 }
 0x1d9   :  { %1671 = vmatprep.subr.mxu1 %v2213_v44  ;;  %v1005_v41 = vmul.f32 %v2052_v49, %v2050_v12 }
 0x1dc   :  { %1672 = vmatpush3.xpose.msra.mxu1 %v1007_v52 }
 0x1dd   :  { %1673 = vmatprep.subr.mxu1 %v2213_v44 }
 0x1e0   :  { %1674 = vmatpush3.xpose.msra.mxu1 %v1006_v58 }
 0x1e1   :  { %1675 = vmatprep.subr.mxu1 %v2213_v44 }
 0x1e4   :  { %1676 = vmatpush3.xpose.msra.mxu1 %v1005_v41 }
 0x1e5   :  { %1677 = vmatprep.subr.mxu1 %v2213_v44 }
 0x1e8   :  { %1678 = vmatpush3.xpose.msra.mxu1 %v2657_v4  ;;  %v2075_v4 = vld [vmem:[%s2857_s0 + $0x58] sm:$0xff]  }
 0x1e9   :  { %1679 = vmatprep.subr.mxu1 %v2213_v44 }
 0x1ec   :  { %1680 = vmatpush3.xpose.msra.mxu1 %v2652_v10  ;;  %v2074_v10 = vld [vmem:[%s2857_s0 + $0x20] sm:$0xff]  }
 0x1ed   :  { %1681 = vmatprep.subr.mxu1 %v2213_v44 }
 0x1f0   :  { %1682 = vmatpush3.xpose.msra.mxu1 %v2648_v26  ;;  %v2073_v26 = vld [vmem:[%s2857_s0 + $0x60] sm:$0xff]  }
 0x1f1   :  { %1683 = vmatprep.subr.mxu1 %v2213_v44 }
 0x1f4   :  { %1684 = vmatpush3.xpose.msra.mxu1 %v2645_v62  ;;  %v2067_v62 = vld [vmem:[%s2857_s0 + $0x78] sm:$0xff]  }
 0x1f5   :  { %1685 = vmatprep.subr.mxu1 %v2213_v44 }
 0x1f8   :  { %1686 = vmatpush3.xpose.msra.mxu1 %v2640_v3  ;;  %v2068_v3 = vld [vmem:[%s2857_s0 + $0x38] sm:$0xff]  }
 0x1f9   :  { %1687 = vmatprep.subr.mxu1 %v2213_v44 }
 0x1fc   :  { %1688 = vmatpush3.xpose.msra.mxu1 %v2628_v8  ;;  %v2071_v8 = vld [vmem:[%s2857_s0 + $0x68] sm:$0xff]  }
 0x1fd   :  { %1689 = vmatprep.subr.mxu1 %v2213_v44 }
 0x200   :  { %1690 = vmatpush3.xpose.msra.mxu1 %v2617_v32  ;;  %v2069_v32 = vld [vmem:[%s2857_s0 + $0x70] sm:$0xff]  }
 0x201   :  { %1691 = vmatprep.subr.mxu1 %v2213_v44 }
 0x204   :  { %1692 = vmatpush3.xpose.msra.mxu1 %v2605_v45  ;;  %v2070_v45 = vld [vmem:[%s2857_s0 + $0x30] sm:$0xff]  }
 0x205   :  { %1630 = vmatprep.subr.bf16.mxu1 %v2067_v62 }
 0x207   :  { %1694 = vmatmul.mubr.f32.vlgmr.msra.gmra.mxu1 %v2521_v19  ;;  %v2072_v19 = vld [vmem:[%s2857_s0 + $0x28] sm:$0xff]  }
 0x208   :  { %1631 = vmatpush3.bf16.msra.mxu1 %v2068_v3 }
 0x209   :  { %1632 = vmatprep.subr.bf16.mxu1 %v2069_v32  ;;  %v2083_v32 = vld [vmem:[%s2857_s0 + $0xb8] sm:$0xff]  }
 0x20c   :  { %1633 = vmatpush3.bf16.msra.mxu1 %v2070_v45  ;;  %v2084_v45 = vld [vmem:[%s2857_s0 + $0xb0] sm:$0xff]  }
 0x20d   :  { %1634 = vmatprep.subr.bf16.mxu1 %v2071_v8  ;;  %v2085_v8 = vld [vmem:[%s2857_s0 + $0xa8] sm:$0xff]  }
 0x210   :  { %1635 = vmatpush3.bf16.msra.mxu1 %v2072_v19  ;;  %v2086_v19 = vld [vmem:[%s2857_s0 + $0xa0] sm:$0xff]  }
 0x211   :  { %1636 = vmatprep.subr.bf16.mxu1 %v2073_v26  ;;  %v2087_v26 = vld [vmem:[%s2857_s0 + $0x98] sm:$0xff]  }
 0x214   :  { %1637 = vmatpush3.bf16.msra.mxu1 %v2074_v10  ;;  %v2088_v10 = vld [vmem:[%s2857_s0 + $0x90] sm:$0xff]  }
 0x215   :  { %1638 = vmatprep.subr.bf16.mxu1 %v2075_v4  ;;  %v2089_v4 = vld [vmem:[%s2857_s0 + $0x88] sm:$0xff]  }
 0x218   :  { %1639 = vmatpush3.bf16.msra.mxu1 %v2076_v60  ;;  %v2090_v60 = vld [vmem:[%s2857_s0 + $0x80] sm:$0xff]  }
 0x219   :  { %1640 = vmatprep.subr.bf16.mxu1 %v2077_v1 }
 0x21c   :  { %1641 = vmatpush3.bf16.msra.mxu1 %v2078_v36 }
 0x21d   :  { %1642 = vmatprep.subr.bf16.mxu1 %v2079_v17 }
 0x220   :  { %1643 = vmatpush3.bf16.msra.mxu1 %v2080_v59  ;;  %v1234_v59 = vld [vmem:[#allocation12] sm:$0x1] }
 0x221   :  { %1644 = vmatprep.subr.bf16.mxu1 %v2081_v7 }
 0x224   :  { %1645 = vmatpush3.bf16.msra.mxu1 %v2082_v23 }
 0x225   :  { %1696 = vmatprep.subr.bf16.mxu1 %v2213_v44 }
 0x287   :  { %v1081_v24 = vpop.f32.mrf.mxu1 }
 0x288   :  { %v1082_v18 = vadd.f32 %v1081_v24, %v1014_v37 }
 0x289   :  { %v1083_v56 = vpop.f32.mrf.mxu1 }
 0x28a   :  { %v1084_v0 = vadd.f32 %v1083_v56, %v1014_v37  ;;  %v1205_v54 = vsel %vm1204_vm2, %v1082_v18, -inf }
 0x28c   :  { %v1174_v15 = vcombine.low %v1082_v18, %v1084_v0  ;;  %v1206_v38 = vsel %vm1204_vm2, %v1084_v0, -inf }
 0x28d   :  { %v1208_v30 = vmax.f32 %v1205_v54, %v1206_v38  ;;  %v1246_v54 = vld [vmem:[#allocation2] sm:$0x1] }
 0x28e   :  { %v1181_v29 = vrot.slane %v1174_v15, %v1180_v35 }
 0x2c7   :  { %v1152_v28 = vpop.f32.mrf.mxu1 }
 0x2c8   :  { %v1153_v40 = vadd.f32 %v1152_v28, %v1014_v37 }
 0x2c9   :  { %v1695_v22 = vpop.f32.mrf.mxu1 }
 0x2ca   :  { %v1170_v42 = vsel %vm1167_vm3, %v1153_v40, -1e+30 }
 0x2cb   :  { %v1188_v14 = vrot.slane %v1170_v42, %v1180_v35  ;;  %v1207_v11 = vsel %vm1204_vm2, %v1170_v42, -inf }
 0x2cc   :  { %v1209_v31 = vmax.f32 %v1208_v30, %v1207_v11  ;;  %v1384_v11 = vld [vmem:[%s2861_s4] sm:$0x1] }
 0x2cd   :  { %v1189_v61 = vcombine.low %v1181_v29, %v1188_v14 }
 0x2ce   :  { %1210 = vmax.xlane.f32.xlu0 %v1209_v31 }
 0x2cf   :  { %v1196_v34 = vrot.slane %v1189_v61, %v1180_v35 }
 0x2d1   :  { %1202 = vst.msk [vmem:[#allocation9] sm:$0x7] %vm1200_vm4, %v1196_v34 }
 0x357   :  { %v1211_v16 = vpop.xlane.xlu0 %1210 }
 0x358   :  { %v1212_v46 = vmax.f32 %v1203_v25, %v1211_v16 }
 0x35a   :  { %v1213_v43 = vsub.f32 %v1203_v25, %v1212_v46  ;;  %1367 = vst.msk [vmem:[#allocation10] sm:$0x1] %vm49_vm5, %v1212_v46  ;;  %1218 = vperm.xlu0 %1727, %v1212_v46  }
 0x35c   :  { %v1214_v36 = vmul.f32 1.442695, %v1213_v43 }
 0x3d5   :  { %v1219_v21 = vpop.permute.xlu0 %1218 }
 0x3d6   :  { %v1224_v51 = vrot.slane %v1219_v21, %v2438_v47 }
 0x3d8   :  { %v1225_v33 = vsub.f32 %v1082_v18, %v1224_v51  ;;  %v1226_v50 = vsub.f32 %v1084_v0, %v1224_v51  ;;  %v1227_v27 = vsub.f32 %v1170_v42, %v1224_v51 }
 0x3da   :  { %v1228_v55 = vmul.f32 1.442695, %v1225_v33  ;;  %v1230_v5 = vmul.f32 1.442695, %v1226_v50  ;;  %v1232_v6 = vmul.f32 1.442695, %v1227_v27 }
 0x3dc   :  { %2053 = vpow2.f32 %v1228_v55 }
 0x3dd   :  { %2055 = vpow2.f32 %v1230_v5 }
 0x3de   :  { %2057 = vpow2.f32 %v1232_v6 }
 0x3df   :  { %2059 = vpow2.f32 %v1214_v36 }
 0x3e9   :  { %v2054_v48 = vpop.eup %2053 }
 0x3ea   :  { %v2056_v52 = vpop.eup %2055  ;;  %v1257_v39 = vpack.c.bf16 %v2054_v48, %v2054_v48  ;;  %v1236_v20 = vsel %vm1204_vm2, %v2054_v48, 0.0 }
 0x3eb   :  { %v2058_v58 = vpop.eup %2057  ;;  %v1258_v12 = vpack.c.bf16 %v2056_v52, %v2056_v52  ;;  %v1237_v49 = vsel %vm1204_vm2, %v2056_v52, 0.0 }
 0x3ec   :  { %v1238_v41 = vadd.f32 %v1237_v49, %v1236_v20  ;;  %v1239_v62 = vsel %vm1204_vm2, %v2058_v58, 0.0  ;;  %v1259_v1 = vpack.c.bf16 %v2058_v58, %v2058_v58  ;;  %v2060_v17 = vpop.eup %2059 }
 0x3ed   :  { %1316 = vmatprep.mubr.bf16.mxu1 %v1258_v12  ;;  %v1235_v7 = vmul.f32 %v2060_v17, %v1234_v59 }
 0x3ee   :  { %1317 = vmatmul.mubr.bf16.vlgmr.msra.gmra.mxu1 %v1257_v39  ;;  %v1240_v3 = vadd.f32 %v1239_v62, %v1238_v41 }
 0x3ef   :  { %1697 = vmatpush3.bf16.msra.mxu1 %v2083_v32  ;;  %1712 = vmatprep.mubr.msk.bf16.mxu1 %vm2214_vm1, %v2213_v44 }
 0x3f0   :  { %1241 = vadd.xlane.f32.xlu1 %v1240_v3  ;;  %1698 = vmatprep.subr.bf16.mxu1 %v2213_v44 }
 0x3f3   :  { %1699 = vmatpush3.bf16.msra.mxu1 %v2084_v45 }
 0x3f4   :  { %1700 = vmatprep.subr.bf16.mxu1 %v2213_v44 }
 0x3f7   :  { %1701 = vmatpush3.bf16.msra.mxu1 %v2085_v8 }
 0x3f8   :  { %1702 = vmatprep.subr.bf16.mxu1 %v2213_v44 }
 0x3fb   :  { %1703 = vmatpush3.bf16.msra.mxu1 %v2086_v19 }
 0x3fc   :  { %1704 = vmatprep.subr.bf16.mxu1 %v2213_v44 }
 0x3ff   :  { %1705 = vmatpush3.bf16.msra.mxu1 %v2087_v26 }
 0x400   :  { %1706 = vmatprep.subr.bf16.mxu1 %v2213_v44 }
 0x403   :  { %1707 = vmatpush3.bf16.msra.mxu1 %v2088_v10 }
 0x404   :  { %1708 = vmatprep.subr.bf16.mxu1 %v2213_v44 }
 0x407   :  { %1709 = vmatpush3.bf16.msra.mxu1 %v2089_v4 }
 0x408   :  { %1710 = vmatprep.subr.bf16.mxu1 %v2213_v44 }
 0x40b   :  { %1711 = vmatpush3.bf16.msra.mxu1 %v2090_v60 }
 0x40e   :  { %1713 = vmatmul.mubr.bf16.vlgmr.msra.gmra.mxu1 %v1259_v1 }
 0x479   :  { %v1242_v23 = vpop.xlane.xlu1 %1241 }
 0x47a   :  { %v1243_v24 = vadd.f32 %v1242_v23, %v1235_v7 }
 0x47c   :  { %1245 = vst.msk [vmem:[#allocation12] sm:$0x1] %vm49_vm5, %v1243_v24 }
 0x483   :  { %v1372_v9 = vld [vmem:[#allocation12] sm:$0x1] }
 0x484   :  { %1375 = vperm.xlu1 %1728, %v1372_v9  }
 0x488   :  { %1249 = vperm.xlu1 %1728, %v2060_v17  }
 0x4ae   :  { %v1646_v2 = vpop.f32.mrf.mxu1 }
 0x4b0   :  { %v1647_v13 = vpop.f32.mrf.mxu1 }
 0x4b1   :  { %v1648_v37 = vadd.f32 %v1647_v13, %v1646_v2 }
 0x4b2   :  { %v1649_v56 = vpop.f32.mrf.mxu1 }
 0x4b4   :  { %v1650_v63 = vpop.f32.mrf.mxu1 }
 0x4ce   :  { %v1358_v18 = vpop.f32.mrf.mxu1 }
 0x4cf   :  { %v1359_v22 = vadd.f32 %v1648_v37, %v1358_v18 }
 0x4d0   :  { %v1714_v0 = vpop.f32.mrf.mxu1 }
 0x4d2   :  { %v1361_v57 = vpop.f32.mrf.mxu1 }
 0x4d4   :  { %v1715_v35 = vpop.f32.mrf.mxu1 }
 0x4ff   :  { %v1376_v15 = vpop.permute.xlu1 %1375 }
 0x500   :  { %v1381_v28 = vrot.slane %v1376_v15, %v2438_v47 }
 0x502   :  { %2061 = vrcp.f32 %v1381_v28 }
 0x503   :  { %v1250_v38 = vpop.permute.xlu1 %1249 }
 0x504   :  { %v1255_v40 = vrot.slane %v1250_v38, %v2438_v47 }
 0x506   :  { %v1256_v42 = vmul.f32 %v1255_v40, %v1246_v54 }
 0x508   :  { %v1364_v30 = vadd.f32 %v1359_v22, %v1256_v42 }
 0x50a   :  { %1366 = vst.msk [vmem:[#allocation2] sm:$0x1] %vm52_vm6, %v1364_v30 }
 0x50f   :  { %v2062_v29 = vpop.eup %2061 }
 0x511   :  { %v1371_v14 = vld [vmem:[#allocation2] sm:$0x1] }
 0x512   :  { %v1383_v31 = vmul.f32 %v2062_v29, %v1371_v14 }
 0x514   :  { %v1385_v61 = vmul.f32 %v1384_v11, %v1383_v31 }
 0x516   :  { %v1386_v34 = vsel %vm52_vm6, %v1385_v61, 0.0 }
 0x517   :  { %1387 = vadd.xlane.f32.xlu1 %v1386_v34 }
 0x518   :  { %2114 = shalt.err (!%p2111_p9)
}
 0x519   :  { %1442 = dma.vmem_to_hbm [thread:$0]  %s1440_s21, 16, %s2866_s9, [#allocation11]  }
 0x51a   :  { %s2218_s4 = smov [#allocation12]  }
 0x51b   :  { %s1449_s25 = sshll.u32 %s2218_s4, 4  ;;  %s1450_s25 = int_to_ptr.vmem [resolvable:$true] %s1449_s25 }
 0x51c   :  { %s2123_s26 = scalar_lea.vmem %s1450_s25, 16  ;;  %s2127_s27 = scalar_lea.vmem %s1450_s25, 32 }
 0x51d   :  { %p2124_p10 = scmp.ne.s32.totalorder %s1450_s25, %s2123_s26  ;;  %p2128_p11 = scmp.lt.s32.totalorder %s1450_s25, %s1450_s25 }
 0x51e   :  { %p2129_p12 = scmp.lt.s32.totalorder %s2127_s27, %s2123_s26 }
 0x520   :  { %p2130_p13 = por %p2129_p12, %p2128_p11 }
 0x522   :  { %p2131_p0 = pnand %p2130_p13, %p2124_p10 }
 0x524   :  { %2134 = shalt.err (!%p2131_p0)
}
 0x525   :  { %1452 = dma.vmem_to_hbm [thread:$0]  %s1450_s25, 16, %s2867_s10, [#allocation11]  }
 0x526   :  { %s1576_s30 = sld [smem:[#allocation3 + $0x1]]  ;;  %s2219_s9 = smov [#allocation6]  }
 0x527   :  { %s1409_s11 = sshll.u32 %s2219_s9, 4  ;;  %s2220_s12 = smov [#allocation7]   ;;  %s1410_s11 = int_to_ptr.vmem [resolvable:$true] %s1409_s11 }
 0x528   :  { %s1419_s13 = sshll.u32 %s2220_s12, 4  ;;  %s2221_s14 = smov [#allocation9]   ;;  %s1420_s13 = int_to_ptr.vmem [resolvable:$true] %s1419_s13 }
 0x529   :  { %s1429_s15 = sshll.u32 %s2221_s14, 4  ;;  %s2143_s10 = scalar_lea.vmem %s1410_s11, 16  ;;  %s2838_s15 = int_to_ptr.vmem [resolvable:$true] %s1429_s15 }
 0x52a   :  { %p2144_p1 = scmp.ne.s32.totalorder %s1410_s11, %s2143_s10  ;;  %s2147_s16 = scalar_lea.vmem %s1410_s11, 32 }
 0x52b   :  { %p2148_p2 = scmp.lt.s32.totalorder %s1410_s11, %s1410_s11  ;;  %p2149_p3 = scmp.lt.s32.totalorder %s2147_s16, %s2143_s10 }
 0x52c   :  { %v1390_v47 = vstv %s1576_s30 }
 0x52d   :  { %p2150_p4 = por %p2149_p3, %p2148_p2 }
 0x52f   :  { %p2151_p5 = pnand %p2150_p4, %p2144_p1 }
 0x5a0   :  { %v1388_v53 = vpop.xlane.xlu1 %1387 }
 0x5a1   :  { %v1391_v25 = vadd.f32 %v1390_v47, %v1388_v53 }
 0x5a3   :  { %v1577_v16 = vmul.f32 -1.442695, %v1391_v25 }
 0x5a5   :  { %2063 = vpow2.f32 %v1577_v16 }
 0x5b2   :  { %v2064_v46 = vpop.eup %2063 }
 0x5b3   :  { %v1395_v43 = vadd.f32 1.0, %v2064_v46 }
 0x5b5   :  { %2065 = vrcp.f32 %v1395_v43 }
 0x5c2   :  { %v2066_v21 = vpop.eup %2065 }
 0x5c3   :  { %1398 = vst.msk [vmem:[#allocation6] sm:$0x1] %vm49_vm5, %v2066_v21  ;;  %vm1399_vm7 = vcmp.ge.f32.partialorder %v2066_v21, 0.5 }
 0x5c4   :  { %v1578_v51 = vsel %vm1399_vm7, 1.0, %v2213_v44 }
 0x5c5   :  { %2154 = shalt.err (!%p2151_p5)
}
 0x5c6   :  { %1412 = dma.vmem_to_hbm [thread:$0]  %s1410_s11, 16, %s2863_s6, [#allocation4]   ;;  %1402 = vst.msk [vmem:[#allocation7] sm:$0x1] %vm49_vm5, %v1578_v51 }
 0x5c7   :  { %s2163_s2 = scalar_lea.vmem %s1420_s13, 16  ;;  %s2167_s18 = scalar_lea.vmem %s1420_s13, 32 }
 0x5c8   :  { %p2164_p6 = scmp.ne.s32.totalorder %s1420_s13, %s2163_s2  ;;  %p2168_p7 = scmp.lt.s32.totalorder %s1420_s13, %s1420_s13 }
 0x5c9   :  { %p2169_p8 = scmp.lt.s32.totalorder %s2167_s18, %s2163_s2 }
 0x5cb   :  { %p2170_p9 = por %p2169_p8, %p2168_p7 }
 0x5cd   :  { %p2171_p10 = pnand %p2170_p9, %p2164_p6 }
 0x5cf   :  { %2174 = shalt.err (!%p2171_p10)
}
 0x5d0   :  { %1422 = dma.vmem_to_hbm [thread:$0]  %s1420_s13, 16, %s2864_s7, [#allocation8]  }
 0x5d1   :  { %s2183_s19 = scalar_lea.vmem %s2838_s15, 48  ;;  %s2187_s6 = scalar_lea.vmem %s2838_s15, 64 }
 0x5d2   :  { %p2184_p11 = scmp.ne.s32.totalorder %s2838_s15, %s2183_s19  ;;  %p2188_p12 = scmp.lt.s32.totalorder %s2838_s15, %s2838_s15 }
 0x5d3   :  { %p2189_p13 = scmp.lt.s32.totalorder %s2187_s6, %s2183_s19 }
 0x5d5   :  { %p2190_p0 = por %p2189_p13, %p2188_p12 }
 0x5d7   :  { %p2191_p1 = pnand %p2190_p0, %p2184_p11 }
 0x5d9   :  { %2194 = shalt.err (!%p2191_p1)
}
 0x5da   :  { %1432 = dma.vmem_to_hbm [thread:$0]  %s2838_s15, 48, %s2865_s8, [#allocation8]  }
 0x5db   :  { %2205 = dma.done.wait [#allocation4], 16  }
 0x5dc   :  { %2206 = vsyncadd [#allocation4], 4294967280 }
 0x5dd   :  { %2207 = dma.done.wait [#allocation8], 64  }
 0x5de   :  { %2208 = vsyncadd [#allocation8], 4294967232 }
 0x5df   :  { %2209 = dma.done.wait [#allocation11], 32  }
 0x5e0   :  { %2210 = vsyncadd [#allocation11], 4294967264 }
 0x5e1   :  { %1468 = vsyncpa [#allocation4], 1 }
 0x5e2   :  { %1469 = vsyncpa [#allocation8], 1 }
 0x5e3   :  { %1470 = vsyncpa [#allocation11], 1 }
 0x5e4   :  { %1471 = vsyncpa [#allocation5], 1 }

</bundles_post_ra>
